<compile_context>
chip_gen: v7x
topology: tpu7x:2x2x1
jax: 0.10.0
libtpu: 0.0.40
codegen_flags: <defaults>
</compile_context>

<pallas_src>
import functools

import numpy as np
import jax
import jax.numpy as jnp
from jax.experimental import pallas as pl
from jax.experimental.pallas import tpu as pltpu


# --------------------------------------------------------------------------
# The fused kernel (one grid step = NB images)
# --------------------------------------------------------------------------
def _cnn_fused_kernel(x_ref, w1_ref, b1_ref, gsel_ref, m9_ref, w2_ref, b2_ref,
                      w1l_ref, b1l_ref, w2l_ref, b2l_ref, out_ref,
                      col1_ref, pooled_ref, col2_ref, lin_ref,
                      *, NB, H, W, SP1A):
    f32, bf16 = jnp.float32, jnp.bfloat16
    Cin = x_ref.shape[0]
    C1 = b1_ref.shape[0]
    C2 = b2_ref.shape[0] // NB
    Hh, Wh = H // 2, W // 2
    S2 = Hh * Wh
    Wp = W + 2
    Sp1 = (H + 2) * Wp
    L1 = x_ref.shape[1]                                   # NB * SP1A lanes

    # ---- conv1: 9 rolled taps -> im2col scratch -> ONE bf16 matmul ---------
    xv = x_ref[...]                                        # (Cin, L1) f32
    for k in range(9):
        dy, dx = k // 3 - 1, k % 3 - 1
        shift = dy * Wp + dx
        tap = xv if shift == 0 else pltpu.roll(xv, (-shift) % L1, 1)
        col1_ref[k * Cin:(k + 1) * Cin, :] = tap.astype(bf16)
    acc1 = jnp.dot(w1_ref[...], col1_ref[...],
                   preferred_element_type=f32)             # (C1, L1)
    y1 = jnp.maximum(acc1 + b1_ref[...], 0.0)

    # ---- maxpool 2x2 / stride 2: rolled maxes + one pick matmul per image --
    hmax = jnp.maximum(y1, pltpu.roll(y1, L1 - 1, 1))       # max(y[p], y[p+1])
    vmax = jnp.maximum(hmax, pltpu.roll(hmax, L1 - Wp, 1))  # ... + row below
    gsel = gsel_ref[...]                                    # (Sp1, S2) bf16
    for i in range(NB):
        v_i = vmax[:, i * SP1A:i * SP1A + Sp1].astype(bf16)
        pooled_ref[i * C1:(i + 1) * C1, :] = jnp.dot(
            v_i, gsel, preferred_element_type=f32)          # (C1, S2)

    # ---- conv2: rolled taps * constant boundary masks -> ONE bf16 matmul ---
    pv = pooled_ref[...]                                    # (NB*C1, S2) f32
    m9 = m9_ref[...]                                        # (9, S2) f32
    for k in range(9):
        dy, dx = k // 3 - 1, k % 3 - 1
        shift = dy * Wh + dx
        tap = pv if shift == 0 else pltpu.roll(pv, (-shift) % S2, 1)
        col2_ref[k * NB * C1:(k + 1) * NB * C1, :] = (
            tap * m9[k:k + 1, :]).astype(bf16)
    acc2 = jnp.dot(w2_ref[...], col2_ref[...],
                   preferred_element_type=f32)              # rows = (c2, i)
    y2 = jnp.maximum(acc2 + b2_ref[...], 0.0).astype(bf16)  # (NB*C2, S2)

    # ---- flatten (torch NCHW .view order) -> lane-dense (NB, C2*S2) slab ---
    for c2 in range(C2):
        lin_ref[:, c2 * S2:(c2 + 1) * S2] = y2[c2 * NB:(c2 + 1) * NB, :]

    # ---- linear1 + ReLU, linear2 -------------------------------------------
    h = jnp.dot(lin_ref[...], w1l_ref[...], preferred_element_type=f32)
    h = jnp.maximum(h + b1l_ref[...], 0.0)                  # (NB, N)
    logits = jnp.dot(h.astype(bf16), w2l_ref[...],
                     preferred_element_type=f32) + b2l_ref[...]
    out_ref[...] = logits[None].astype(out_ref.dtype)       # (1, NB, Dout)


# --------------------------------------------------------------------------
# Wrapper: one pallas_call, grid over groups of NB images
# --------------------------------------------------------------------------
def cnn_forward(x_nchw, params):
    f32, bf16 = jnp.float32, jnp.bfloat16
    B, Cin, H, W = x_nchw.shape
    conv1_w = params["conv1_w"].astype(f32)                 # (C1, Cin, 3, 3)
    conv2_w = params["conv2_w"].astype(f32)                 # (C2, C1, 3, 3)
    C1, C2 = conv1_w.shape[0], conv2_w.shape[0]
    assert H % 2 == 0 and W % 2 == 0
    Hh, Wh = H // 2, W // 2
    S2 = Hh * Wh
    Wp = W + 2
    Sp1 = (H + 2) * Wp
    SP1A = ((Sp1 + 127) // 128) * 128                       # per-image lane stride
    N = params["lin1_w"].shape[0]
    Dout = params["lin2_w"].shape[0]
    assert params["lin1_w"].shape[1] == C2 * S2

    NB = 2 if B % 2 == 0 else 1                             # images per grid step
    n_groups = B // NB

    # --- input: 2-D zero-pad each image once in the wrapper, images on lanes
    xp = jnp.pad(x_nchw.astype(f32), ((0, 0), (0, 0), (1, 1), (1, 1)))
    xp = jnp.transpose(xp, (1, 0, 2, 3)).reshape(Cin, B, Sp1)
    xp = jnp.pad(xp, ((0, 0), (0, 0), (0, SP1A - Sp1)))
    xp = xp.reshape(Cin, B * SP1A)                          # (Cin, B*SP1A) f32

    # --- trace-time constant folding (matmul operands in bf16) --------------
    w1m = conv1_w.transpose(0, 2, 3, 1).reshape(C1, 9 * Cin).astype(bf16)
    b1c = params["conv1_b"].astype(f32).reshape(C1, 1)

    gsel = np.zeros((Sp1, S2), np.float32)                  # padded pos -> pooled pos
    for hh in range(Hh):
        for ww in range(Wh):
            gsel[(2 * hh + 1) * Wp + (2 * ww + 1), hh * Wh + ww] = 1.0
    gsel = jnp.asarray(gsel, bf16)

    m9 = np.zeros((9, S2), np.float32)                      # conv2 boundary masks
    for k in range(9):
        dy, dx = k // 3 - 1, k % 3 - 1
        for hh in range(Hh):
            for ww in range(Wh):
                if 0 <= hh + dy < Hh and 0 <= ww + dx < Wh:
                    m9[k, hh * Wh + ww] = 1.0
    m9 = jnp.asarray(m9)

    # conv2 weight: rows = (c2, i), cols = (k, i, c1); block-diag over images
    w2k = conv2_w.transpose(2, 3, 0, 1).reshape(9, C2, C1)
    w2big = jnp.einsum("kab,ij->aikjb", w2k, jnp.eye(NB, dtype=f32))
    w2big = w2big.reshape(NB * C2, 9 * NB * C1).astype(bf16)
    b2big = jnp.repeat(params["conv2_b"].astype(f32), NB).reshape(NB * C2, 1)

    w1l = params["lin1_w"].astype(f32).T.astype(bf16)       # (C2*S2, N)
    b1l = params["lin1_b"].astype(f32).reshape(1, N)
    w2l = params["lin2_w"].astype(f32).T.astype(bf16)       # (N, Dout)
    b2l = params["lin2_b"].astype(f32).reshape(1, Dout)

    kernel = functools.partial(_cnn_fused_kernel, NB=NB, H=H, W=W, SP1A=SP1A)

    def _full(arr):  # whole-array block, same block every grid step
        return pl.BlockSpec(arr.shape, lambda g: (0, 0))

    out = pl.pallas_call(
        kernel,
        out_shape=jax.ShapeDtypeStruct((n_groups, NB, Dout), f32),
        grid_spec=pltpu.PrefetchScalarGridSpec(
            num_scalar_prefetch=0,
            grid=(n_groups,),
            in_specs=[
                pl.BlockSpec((Cin, NB * SP1A), lambda g: (0, g)),   # x block
                _full(w1m), _full(b1c), _full(gsel), _full(m9),
                _full(w2big), _full(b2big),
                _full(w1l), _full(b1l), _full(w2l), _full(b2l),
            ],
            out_specs=pl.BlockSpec((1, NB, Dout), lambda g: (g, 0, 0)),
            scratch_shapes=[
                pltpu.VMEM((9 * Cin, NB * SP1A), bf16),     # conv1 im2col stack
                pltpu.VMEM((NB * C1, S2), f32),             # pooled activations
                pltpu.VMEM((9 * NB * C1, S2), bf16),        # conv2 im2col stack
                pltpu.VMEM((NB, C2 * S2), bf16),            # lane-dense flatten
            ]),
        compiler_params=pltpu.CompilerParams(
            dimension_semantics=("parallel",)),
    )(xp, w1m, b1c, gsel, m9, w2big, b2big, w1l, b1l, w2l, b2l)
    return out.reshape(B, Dout)


# --------------------------------------------------------------------------
# Pure-JAX reference (correctness sanity check)
# --------------------------------------------------------------------------
def ref_forward(x_nchw, params):
    def conv(x, w, b):
        y = jax.lax.conv_general_dilated(
            x, w, window_strides=(1, 1), padding=((1, 1), (1, 1)),
            dimension_numbers=("NCHW", "OIHW", "NCHW"))
        return jax.nn.relu(y + b[None, :, None, None])

    y = conv(x_nchw, params["conv1_w"], params["conv1_b"])
    B, C, H, W = y.shape
    y = y.reshape(B, C, H // 2, 2, W // 2, 2).max(axis=(3, 5))   # maxpool 2x2
    y = conv(y, params["conv2_w"], params["conv2_b"])
    flat = y.reshape(B, -1)
    h = jax.nn.relu(flat @ params["lin1_w"].T + params["lin1_b"])
    return h @ params["lin2_w"].T + params["lin2_b"]


# --------------------------------------------------------------------------
# Main
# --------------------------------------------------------------------------
if __name__ == "__main__":
    batch = 2
    in_channels = 4
    filters = 4
    hidden_layers = 32
    output_size = 10
    input_size = 16                     # spatial H = W

    lin1_in = filters * input_size * input_size   # == 4*filters*(H/2)*(W/2)

    key = jax.random.PRNGKey(0)
    ks = jax.random.split(key, 9)
    params = {
        "conv1_w": 0.1 * jax.random.normal(ks[0], (filters, in_channels, 3, 3), jnp.float32),
        "conv1_b": 0.1 * jax.random.normal(ks[1], (filters,), jnp.float32),
        "conv2_w": 0.1 * jax.random.normal(ks[2], (4 * filters, filters, 3, 3), jnp.float32),
        "conv2_b": 0.1 * jax.random.normal(ks[3], (4 * filters,), jnp.float32),
        "lin1_w": 0.05 * jax.random.normal(ks[4], (hidden_layers, lin1_in), jnp.float32),
        "lin1_b": 0.1 * jax.random.normal(ks[5], (hidden_layers,), jnp.float32),
        "lin2_w": 0.1 * jax.random.normal(ks[6], (output_size, hidden_layers), jnp.float32),
        "lin2_b": 0.1 * jax.random.normal(ks[7], (output_size,), jnp.float32),
    }

    x = jax.random.normal(ks[8], (batch, in_channels, input_size, input_size), jnp.float32)

    fwd = jax.jit(cnn_forward)
    out = jax.block_until_ready(fwd(x, params))
    assert out.shape == (batch, output_size), out.shape

    ref = jax.block_until_ready(ref_forward(x, params))
    assert jnp.allclose(out, ref, rtol=3e-2, atol=3e-2), (
        f"max abs diff {float(jnp.max(jnp.abs(out - ref)))}")

    print("KERNEL_OK")
</pallas_src>

<mosaic_0001>
module attributes {stable_mosaic.version = 11 : i64} {
  func.func @_cnn_fused_kernel(%arg0: i32, %arg1: memref<4x768xf32, #tpu.memory_space<vmem>>, %arg2: memref<4x36xbf16, #tpu.memory_space<vmem>>, %arg3: memref<4x1xf32, #tpu.memory_space<vmem>>, %arg4: memref<324x64xbf16, #tpu.memory_space<vmem>>, %arg5: memref<9x64xf32, #tpu.memory_space<vmem>>, %arg6: memref<32x72xbf16, #tpu.memory_space<vmem>>, %arg7: memref<32x1xf32, #tpu.memory_space<vmem>>, %arg8: memref<1024x32xbf16, #tpu.memory_space<vmem>>, %arg9: memref<1x32xf32, #tpu.memory_space<vmem>>, %arg10: memref<32x10xbf16, #tpu.memory_space<vmem>>, %arg11: memref<1x10xf32, #tpu.memory_space<vmem>>, %arg12: memref<1x2x10xf32, #tpu.memory_space<vmem>>, %arg13: memref<36x768xbf16, #tpu.memory_space<vmem>>, %arg14: memref<8x64xf32, #tpu.memory_space<vmem>>, %arg15: memref<72x64xbf16, #tpu.memory_space<vmem>>, %arg16: memref<2x1024xbf16, #tpu.memory_space<vmem>>) attributes {dimension_semantics = [#tpu.dimension_semantics<parallel>], iteration_bounds = array<i64: 1>, scalar_prefetch = 0 : i64, scratch_operands = 4 : i64, tpu.core_type = #tpu.core_type<tc>, window_params = [{transform_indices = @transform_0, window_bounds = array<i64: 4, 768>}, {pipeline_mode = #tpu.pipeline_mode<synchronous>, transform_indices = @transform_1, window_bounds = array<i64: 4, 36>}, {pipeline_mode = #tpu.pipeline_mode<synchronous>, transform_indices = @transform_2, window_bounds = array<i64: 4, 1>}, {pipeline_mode = #tpu.pipeline_mode<synchronous>, transform_indices = @transform_3, window_bounds = array<i64: 324, 64>}, {pipeline_mode = #tpu.pipeline_mode<synchronous>, transform_indices = @transform_4, window_bounds = array<i64: 9, 64>}, {pipeline_mode = #tpu.pipeline_mode<synchronous>, transform_indices = @transform_5, window_bounds = array<i64: 32, 72>}, {pipeline_mode = #tpu.pipeline_mode<synchronous>, transform_indices = @transform_6, window_bounds = array<i64: 32, 1>}, {pipeline_mode = #tpu.pipeline_mode<synchronous>, transform_indices = @transform_7, window_bounds = array<i64: 1024, 32>}, {pipeline_mode = #tpu.pipeline_mode<synchronous>, transform_indices = @transform_8, window_bounds = array<i64: 1, 32>}, {pipeline_mode = #tpu.pipeline_mode<synchronous>, transform_indices = @transform_9, window_bounds = array<i64: 32, 10>}, {pipeline_mode = #tpu.pipeline_mode<synchronous>, transform_indices = @transform_10, window_bounds = array<i64: 1, 10>}, {transform_indices = @transform_11, window_bounds = array<i64: 1, 2, 10>}]} {
    %c0 = arith.constant 0 : index
    %c0_0 = arith.constant 0 : index
    %0 = vector.load %arg1[%c0, %c0_0] : memref<4x768xf32, #tpu.memory_space<vmem>>, vector<4x768xf32>
    %c19_i32 = arith.constant 19 : i32
    %1 = tpu.dynamic_rotate %0 by %c19_i32 dim 1 : vector<4x768xf32>, i32 -> vector<4x768xf32>
    %2 = arith.truncf %1 : vector<4x768xf32> to vector<4x768xbf16>
    %c0_1 = arith.constant 0 : index
    %c0_2 = arith.constant 0 : index
    %3 = vector.load %arg13[%c0_1, %c0_2] : memref<36x768xbf16, #tpu.memory_space<vmem>>, vector<4x768xbf16>
    tpu.vector_store %arg13[%c0_1, %c0_2], %2 {strides = array<i32>} : memref<36x768xbf16, #tpu.memory_space<vmem>>, vector<4x768xbf16>,
    %c18_i32 = arith.constant 18 : i32
    %4 = tpu.dynamic_rotate %0 by %c18_i32 dim 1 : vector<4x768xf32>, i32 -> vector<4x768xf32>
    %5 = arith.truncf %4 : vector<4x768xf32> to vector<4x768xbf16>
    %c4 = arith.constant 4 : index
    %c0_3 = arith.constant 0 : index
    %6 = vector.load %arg13[%c4, %c0_3] : memref<36x768xbf16, #tpu.memory_space<vmem>>, vector<4x768xbf16>
    tpu.vector_store %arg13[%c4, %c0_3], %5 {strides = array<i32>} : memref<36x768xbf16, #tpu.memory_space<vmem>>, vector<4x768xbf16>,
    %c17_i32 = arith.constant 17 : i32
    %7 = tpu.dynamic_rotate %0 by %c17_i32 dim 1 : vector<4x768xf32>, i32 -> vector<4x768xf32>
    %8 = arith.truncf %7 : vector<4x768xf32> to vector<4x768xbf16>
    %c8 = arith.constant 8 : index
    %c0_4 = arith.constant 0 : index
    %9 = vector.load %arg13[%c8, %c0_4] : memref<36x768xbf16, #tpu.memory_space<vmem>>, vector<4x768xbf16>
    tpu.vector_store %arg13[%c8, %c0_4], %8 {strides = array<i32>} : memref<36x768xbf16, #tpu.memory_space<vmem>>, vector<4x768xbf16>,
    %c1_i32 = arith.constant 1 : i32
    %10 = tpu.dynamic_rotate %0 by %c1_i32 dim 1 : vector<4x768xf32>, i32 -> vector<4x768xf32>
    %11 = arith.truncf %10 : vector<4x768xf32> to vector<4x768xbf16>
    %c12 = arith.constant 12 : index
    %c0_5 = arith.constant 0 : index
    %12 = vector.load %arg13[%c12, %c0_5] : memref<36x768xbf16, #tpu.memory_space<vmem>>, vector<4x768xbf16>
    tpu.vector_store %arg13[%c12, %c0_5], %11 {strides = array<i32>} : memref<36x768xbf16, #tpu.memory_space<vmem>>, vector<4x768xbf16>,
    %13 = arith.truncf %0 : vector<4x768xf32> to vector<4x768xbf16>
    %c16 = arith.constant 16 : index
    %c0_6 = arith.constant 0 : index
    %14 = vector.load %arg13[%c16, %c0_6] : memref<36x768xbf16, #tpu.memory_space<vmem>>, vector<4x768xbf16>
    tpu.vector_store %arg13[%c16, %c0_6], %13 {strides = array<i32>} : memref<36x768xbf16, #tpu.memory_space<vmem>>, vector<4x768xbf16>,
    %c767_i32 = arith.constant 767 : i32
    %15 = tpu.dynamic_rotate %0 by %c767_i32 dim 1 : vector<4x768xf32>, i32 -> vector<4x768xf32>
    %16 = arith.truncf %15 : vector<4x768xf32> to vector<4x768xbf16>
    %c20 = arith.constant 20 : index
    %c0_7 = arith.constant 0 : index
    %17 = vector.load %arg13[%c20, %c0_7] : memref<36x768xbf16, #tpu.memory_space<vmem>>, vector<4x768xbf16>
    tpu.vector_store %arg13[%c20, %c0_7], %16 {strides = array<i32>} : memref<36x768xbf16, #tpu.memory_space<vmem>>, vector<4x768xbf16>,
    %c751_i32 = arith.constant 751 : i32
    %18 = tpu.dynamic_rotate %0 by %c751_i32 dim 1 : vector<4x768xf32>, i32 -> vector<4x768xf32>
    %19 = arith.truncf %18 : vector<4x768xf32> to vector<4x768xbf16>
    %c24 = arith.constant 24 : index
    %c0_8 = arith.constant 0 : index
    %20 = vector.load %arg13[%c24, %c0_8] : memref<36x768xbf16, #tpu.memory_space<vmem>>, vector<4x768xbf16>
    tpu.vector_store %arg13[%c24, %c0_8], %19 {strides = array<i32>} : memref<36x768xbf16, #tpu.memory_space<vmem>>, vector<4x768xbf16>,
    %c750_i32 = arith.constant 750 : i32
    %21 = tpu.dynamic_rotate %0 by %c750_i32 dim 1 : vector<4x768xf32>, i32 -> vector<4x768xf32>
    %22 = arith.truncf %21 : vector<4x768xf32> to vector<4x768xbf16>
    %c28 = arith.constant 28 : index
    %c0_9 = arith.constant 0 : index
    %23 = vector.load %arg13[%c28, %c0_9] : memref<36x768xbf16, #tpu.memory_space<vmem>>, vector<4x768xbf16>
    tpu.vector_store %arg13[%c28, %c0_9], %22 {strides = array<i32>} : memref<36x768xbf16, #tpu.memory_space<vmem>>, vector<4x768xbf16>,
    %c749_i32 = arith.constant 749 : i32
    %24 = tpu.dynamic_rotate %0 by %c749_i32 dim 1 : vector<4x768xf32>, i32 -> vector<4x768xf32>
    %25 = arith.truncf %24 : vector<4x768xf32> to vector<4x768xbf16>
    %c32 = arith.constant 32 : index
    %c0_10 = arith.constant 0 : index
    %26 = vector.load %arg13[%c32, %c0_10] : memref<36x768xbf16, #tpu.memory_space<vmem>>, vector<4x768xbf16>
    tpu.vector_store %arg13[%c32, %c0_10], %25 {strides = array<i32>} : memref<36x768xbf16, #tpu.memory_space<vmem>>, vector<4x768xbf16>,
    %c0_11 = arith.constant 0 : index
    %c0_12 = arith.constant 0 : index
    %27 = vector.load %arg2[%c0_11, %c0_12] : memref<4x36xbf16, #tpu.memory_space<vmem>>, vector<4x36xbf16>
    %c0_13 = arith.constant 0 : index
    %c0_14 = arith.constant 0 : index
    %28 = vector.load %arg13[%c0_13, %c0_14] : memref<36x768xbf16, #tpu.memory_space<vmem>>, vector<36x768xbf16>
    %cst = arith.constant dense<0.000000e+00> : vector<4x768xf32>
    %29 = tpu.matmul %27, %28, %cst {dimension_numbers = #tpu.dot_dimension_numbers<[1], [0], [0], [1], [0, 0, 1, 1], [], []>} : vector<4x36xbf16>, vector<36x768xbf16>, vector<4x768xf32> -> vector<4x768xf32>
    %c0_15 = arith.constant 0 : index
    %c0_16 = arith.constant 0 : index
    %30 = vector.load %arg3[%c0_15, %c0_16] : memref<4x1xf32, #tpu.memory_space<vmem>>, vector<4x1xf32>
    %31 = vector.broadcast %30 : vector<4x1xf32> to vector<4x768xf32>
    %32 = arith.addf %29, %31 : vector<4x768xf32>
    %cst_17 = arith.constant 0.000000e+00 : f32
    %33 = vector.broadcast %cst_17 : f32 to vector<4x768xf32>
    %34 = arith.maximumf %32, %33 : vector<4x768xf32>
    %c767_i32_18 = arith.constant 767 : i32
    %35 = tpu.dynamic_rotate %34 by %c767_i32_18 dim 1 : vector<4x768xf32>, i32 -> vector<4x768xf32>
    %36 = arith.maximumf %34, %35 : vector<4x768xf32>
    %c750_i32_19 = arith.constant 750 : i32
    %37 = tpu.dynamic_rotate %36 by %c750_i32_19 dim 1 : vector<4x768xf32>, i32 -> vector<4x768xf32>
    %38 = arith.maximumf %36, %37 : vector<4x768xf32>
    %c0_20 = arith.constant 0 : index
    %c0_21 = arith.constant 0 : index
    %39 = vector.load %arg4[%c0_20, %c0_21] : memref<324x64xbf16, #tpu.memory_space<vmem>>, vector<324x64xbf16>
    %40 = vector.extract_strided_slice %38 {offsets = [0, 0], sizes = [4, 324], strides = [1, 1]} : vector<4x768xf32> to vector<4x324xf32>
    %41 = arith.truncf %40 : vector<4x324xf32> to vector<4x324xbf16>
    %cst_22 = arith.constant dense<0.000000e+00> : vector<4x64xf32>
    %42 = tpu.matmul %41, %39, %cst_22 {dimension_numbers = #tpu.dot_dimension_numbers<[1], [0], [0], [1], [0, 0, 1, 1], [], []>} : vector<4x324xbf16>, vector<324x64xbf16>, vector<4x64xf32> -> vector<4x64xf32>
    %c0_23 = arith.constant 0 : index
    %c0_24 = arith.constant 0 : index
    %43 = vector.load %arg14[%c0_23, %c0_24] : memref<8x64xf32, #tpu.memory_space<vmem>>, vector<4x64xf32>
    tpu.vector_store %arg14[%c0_23, %c0_24], %42 {strides = array<i32>} : memref<8x64xf32, #tpu.memory_space<vmem>>, vector<4x64xf32>,
    %44 = vector.extract_strided_slice %38 {offsets = [0, 384], sizes = [4, 324], strides = [1, 1]} : vector<4x768xf32> to vector<4x324xf32>
    %45 = arith.truncf %44 : vector<4x324xf32> to vector<4x324xbf16>
    %cst_25 = arith.constant dense<0.000000e+00> : vector<4x64xf32>
    %46 = tpu.matmul %45, %39, %cst_25 {dimension_numbers = #tpu.dot_dimension_numbers<[1], [0], [0], [1], [0, 0, 1, 1], [], []>} : vector<4x324xbf16>, vector<324x64xbf16>, vector<4x64xf32> -> vector<4x64xf32>
    %c4_26 = arith.constant 4 : index
    %c0_27 = arith.constant 0 : index
    %47 = vector.load %arg14[%c4_26, %c0_27] : memref<8x64xf32, #tpu.memory_space<vmem>>, vector<4x64xf32>
    tpu.vector_store %arg14[%c4_26, %c0_27], %46 {strides = array<i32>} : memref<8x64xf32, #tpu.memory_space<vmem>>, vector<4x64xf32>,
    %c0_28 = arith.constant 0 : index
    %c0_29 = arith.constant 0 : index
    %48 = vector.load %arg14[%c0_28, %c0_29] : memref<8x64xf32, #tpu.memory_space<vmem>>, vector<8x64xf32>
    %c0_30 = arith.constant 0 : index
    %c0_31 = arith.constant 0 : index
    %49 = vector.load %arg5[%c0_30, %c0_31] : memref<9x64xf32, #tpu.memory_space<vmem>>, vector<9x64xf32>
    %c9_i32 = arith.constant 9 : i32
    %50 = tpu.dynamic_rotate %48 by %c9_i32 dim 1 : vector<8x64xf32>, i32 -> vector<8x64xf32>
    %51 = vector.extract_strided_slice %49 {offsets = [0, 0], sizes = [1, 64], strides = [1, 1]} : vector<9x64xf32> to vector<1x64xf32>
    %52 = vector.broadcast %51 : vector<1x64xf32> to vector<8x64xf32>
    %53 = arith.mulf %50, %52 : vector<8x64xf32>
    %54 = arith.truncf %53 : vector<8x64xf32> to vector<8x64xbf16>
    %c0_32 = arith.constant 0 : index
    %c0_33 = arith.constant 0 : index
    %55 = vector.load %arg15[%c0_32, %c0_33] : memref<72x64xbf16, #tpu.memory_space<vmem>>, vector<8x64xbf16>
    tpu.vector_store %arg15[%c0_32, %c0_33], %54 {strides = array<i32>} : memref<72x64xbf16, #tpu.memory_space<vmem>>, vector<8x64xbf16>,
    %c8_i32 = arith.constant 8 : i32
    %56 = tpu.dynamic_rotate %48 by %c8_i32 dim 1 : vector<8x64xf32>, i32 -> vector<8x64xf32>
    %57 = vector.extract_strided_slice %49 {offsets = [1, 0], sizes = [1, 64], strides = [1, 1]} : vector<9x64xf32> to vector<1x64xf32>
    %58 = vector.broadcast %57 : vector<1x64xf32> to vector<8x64xf32>
    %59 = arith.mulf %56, %58 : vector<8x64xf32>
    %60 = arith.truncf %59 : vector<8x64xf32> to vector<8x64xbf16>
    %c8_34 = arith.constant 8 : index
    %c0_35 = arith.constant 0 : index
    %61 = vector.load %arg15[%c8_34, %c0_35] : memref<72x64xbf16, #tpu.memory_space<vmem>>, vector<8x64xbf16>
    tpu.vector_store %arg15[%c8_34, %c0_35], %60 {strides = array<i32>} : memref<72x64xbf16, #tpu.memory_space<vmem>>, vector<8x64xbf16>,
    %c7_i32 = arith.constant 7 : i32
    %62 = tpu.dynamic_rotate %48 by %c7_i32 dim 1 : vector<8x64xf32>, i32 -> vector<8x64xf32>
    %63 = vector.extract_strided_slice %49 {offsets = [2, 0], sizes = [1, 64], strides = [1, 1]} : vector<9x64xf32> to vector<1x64xf32>
    %64 = vector.broadcast %63 : vector<1x64xf32> to vector<8x64xf32>
    %65 = arith.mulf %62, %64 : vector<8x64xf32>
    %66 = arith.truncf %65 : vector<8x64xf32> to vector<8x64xbf16>
    %c16_36 = arith.constant 16 : index
    %c0_37 = arith.constant 0 : index
    %67 = vector.load %arg15[%c16_36, %c0_37] : memref<72x64xbf16, #tpu.memory_space<vmem>>, vector<8x64xbf16>
    tpu.vector_store %arg15[%c16_36, %c0_37], %66 {strides = array<i32>} : memref<72x64xbf16, #tpu.memory_space<vmem>>, vector<8x64xbf16>,
    %c1_i32_38 = arith.constant 1 : i32
    %68 = tpu.dynamic_rotate %48 by %c1_i32_38 dim 1 : vector<8x64xf32>, i32 -> vector<8x64xf32>
    %69 = vector.extract_strided_slice %49 {offsets = [3, 0], sizes = [1, 64], strides = [1, 1]} : vector<9x64xf32> to vector<1x64xf32>
    %70 = vector.broadcast %69 : vector<1x64xf32> to vector<8x64xf32>
    %71 = arith.mulf %68, %70 : vector<8x64xf32>
    %72 = arith.truncf %71 : vector<8x64xf32> to vector<8x64xbf16>
    %c24_39 = arith.constant 24 : index
    %c0_40 = arith.constant 0 : index
    %73 = vector.load %arg15[%c24_39, %c0_40] : memref<72x64xbf16, #tpu.memory_space<vmem>>, vector<8x64xbf16>
    tpu.vector_store %arg15[%c24_39, %c0_40], %72 {strides = array<i32>} : memref<72x64xbf16, #tpu.memory_space<vmem>>, vector<8x64xbf16>,
    %74 = vector.extract_strided_slice %49 {offsets = [4, 0], sizes = [1, 64], strides = [1, 1]} : vector<9x64xf32> to vector<1x64xf32>
    %75 = vector.broadcast %74 : vector<1x64xf32> to vector<8x64xf32>
    %76 = arith.mulf %48, %75 : vector<8x64xf32>
    %77 = arith.truncf %76 : vector<8x64xf32> to vector<8x64xbf16>
    %c32_41 = arith.constant 32 : index
    %c0_42 = arith.constant 0 : index
    %78 = vector.load %arg15[%c32_41, %c0_42] : memref<72x64xbf16, #tpu.memory_space<vmem>>, vector<8x64xbf16>
    tpu.vector_store %arg15[%c32_41, %c0_42], %77 {strides = array<i32>} : memref<72x64xbf16, #tpu.memory_space<vmem>>, vector<8x64xbf16>,
    %c63_i32 = arith.constant 63 : i32
    %79 = tpu.dynamic_rotate %48 by %c63_i32 dim 1 : vector<8x64xf32>, i32 -> vector<8x64xf32>
    %80 = vector.extract_strided_slice %49 {offsets = [5, 0], sizes = [1, 64], strides = [1, 1]} : vector<9x64xf32> to vector<1x64xf32>
    %81 = vector.broadcast %80 : vector<1x64xf32> to vector<8x64xf32>
    %82 = arith.mulf %79, %81 : vector<8x64xf32>
    %83 = arith.truncf %82 : vector<8x64xf32> to vector<8x64xbf16>
    %c40 = arith.constant 40 : index
    %c0_43 = arith.constant 0 : index
    %84 = vector.load %arg15[%c40, %c0_43] : memref<72x64xbf16, #tpu.memory_space<vmem>>, vector<8x64xbf16>
    tpu.vector_store %arg15[%c40, %c0_43], %83 {strides = array<i32>} : memref<72x64xbf16, #tpu.memory_space<vmem>>, vector<8x64xbf16>,
    %c57_i32 = arith.constant 57 : i32
    %85 = tpu.dynamic_rotate %48 by %c57_i32 dim 1 : vector<8x64xf32>, i32 -> vector<8x64xf32>
    %86 = vector.extract_strided_slice %49 {offsets = [6, 0], sizes = [1, 64], strides = [1, 1]} : vector<9x64xf32> to vector<1x64xf32>
    %87 = vector.broadcast %86 : vector<1x64xf32> to vector<8x64xf32>
    %88 = arith.mulf %85, %87 : vector<8x64xf32>
    %89 = arith.truncf %88 : vector<8x64xf32> to vector<8x64xbf16>
    %c48 = arith.constant 48 : index
    %c0_44 = arith.constant 0 : index
    %90 = vector.load %arg15[%c48, %c0_44] : memref<72x64xbf16, #tpu.memory_space<vmem>>, vector<8x64xbf16>
    tpu.vector_store %arg15[%c48, %c0_44], %89 {strides = array<i32>} : memref<72x64xbf16, #tpu.memory_space<vmem>>, vector<8x64xbf16>,
    %c56_i32 = arith.constant 56 : i32
    %91 = tpu.dynamic_rotate %48 by %c56_i32 dim 1 : vector<8x64xf32>, i32 -> vector<8x64xf32>
    %92 = vector.extract_strided_slice %49 {offsets = [7, 0], sizes = [1, 64], strides = [1, 1]} : vector<9x64xf32> to vector<1x64xf32>
    %93 = vector.broadcast %92 : vector<1x64xf32> to vector<8x64xf32>
    %94 = arith.mulf %91, %93 : vector<8x64xf32>
    %95 = arith.truncf %94 : vector<8x64xf32> to vector<8x64xbf16>
    %c56 = arith.constant 56 : index
    %c0_45 = arith.constant 0 : index
    %96 = vector.load %arg15[%c56, %c0_45] : memref<72x64xbf16, #tpu.memory_space<vmem>>, vector<8x64xbf16>
    tpu.vector_store %arg15[%c56, %c0_45], %95 {strides = array<i32>} : memref<72x64xbf16, #tpu.memory_space<vmem>>, vector<8x64xbf16>,
    %c55_i32 = arith.constant 55 : i32
    %97 = tpu.dynamic_rotate %48 by %c55_i32 dim 1 : vector<8x64xf32>, i32 -> vector<8x64xf32>
    %98 = vector.extract_strided_slice %49 {offsets = [8, 0], sizes = [1, 64], strides = [1, 1]} : vector<9x64xf32> to vector<1x64xf32>
    %99 = vector.broadcast %98 : vector<1x64xf32> to vector<8x64xf32>
    %100 = arith.mulf %97, %99 : vector<8x64xf32>
    %101 = arith.truncf %100 : vector<8x64xf32> to vector<8x64xbf16>
    %c64 = arith.constant 64 : index
    %c0_46 = arith.constant 0 : index
    %102 = vector.load %arg15[%c64, %c0_46] : memref<72x64xbf16, #tpu.memory_space<vmem>>, vector<8x64xbf16>
    tpu.vector_store %arg15[%c64, %c0_46], %101 {strides = array<i32>} : memref<72x64xbf16, #tpu.memory_space<vmem>>, vector<8x64xbf16>,
    %c0_47 = arith.constant 0 : index
    %c0_48 = arith.constant 0 : index
    %103 = vector.load %arg6[%c0_47, %c0_48] : memref<32x72xbf16, #tpu.memory_space<vmem>>, vector<32x72xbf16>
    %c0_49 = arith.constant 0 : index
    %c0_50 = arith.constant 0 : index
    %104 = vector.load %arg15[%c0_49, %c0_50] : memref<72x64xbf16, #tpu.memory_space<vmem>>, vector<72x64xbf16>
    %cst_51 = arith.constant dense<0.000000e+00> : vector<32x64xf32>
    %105 = tpu.matmul %103, %104, %cst_51 {dimension_numbers = #tpu.dot_dimension_numbers<[1], [0], [0], [1], [0, 0, 1, 1], [], []>} : vector<32x72xbf16>, vector<72x64xbf16>, vector<32x64xf32> -> vector<32x64xf32>
    %c0_52 = arith.constant 0 : index
    %c0_53 = arith.constant 0 : index
    %106 = vector.load %arg7[%c0_52, %c0_53] : memref<32x1xf32, #tpu.memory_space<vmem>>, vector<32x1xf32>
    %107 = vector.broadcast %106 : vector<32x1xf32> to vector<32x64xf32>
    %108 = arith.addf %105, %107 : vector<32x64xf32>
    %cst_54 = arith.constant 0.000000e+00 : f32
    %109 = vector.broadcast %cst_54 : f32 to vector<32x64xf32>
    %110 = arith.maximumf %108, %109 : vector<32x64xf32>
    %111 = arith.truncf %110 : vector<32x64xf32> to vector<32x64xbf16>
    %112 = vector.extract_strided_slice %111 {offsets = [0, 0], sizes = [2, 64], strides = [1, 1]} : vector<32x64xbf16> to vector<2x64xbf16>
    %c0_55 = arith.constant 0 : index
    %c0_56 = arith.constant 0 : index
    %113 = vector.load %arg16[%c0_55, %c0_56] : memref<2x1024xbf16, #tpu.memory_space<vmem>>, vector<2x64xbf16>
    tpu.vector_store %arg16[%c0_55, %c0_56], %112 {strides = array<i32>} : memref<2x1024xbf16, #tpu.memory_space<vmem>>, vector<2x64xbf16>,
    %114 = vector.extract_strided_slice %111 {offsets = [2, 0], sizes = [2, 64], strides = [1, 1]} : vector<32x64xbf16> to vector<2x64xbf16>
    %c0_57 = arith.constant 0 : index
    %c64_58 = arith.constant 64 : index
    %115 = vector.load %arg16[%c0_57, %c64_58] : memref<2x1024xbf16, #tpu.memory_space<vmem>>, vector<2x64xbf16>
    tpu.vector_store %arg16[%c0_57, %c64_58], %114 {strides = array<i32>} : memref<2x1024xbf16, #tpu.memory_space<vmem>>, vector<2x64xbf16>,
    %116 = vector.extract_strided_slice %111 {offsets = [4, 0], sizes = [2, 64], strides = [1, 1]} : vector<32x64xbf16> to vector<2x64xbf16>
    %c0_59 = arith.constant 0 : index
    %c128 = arith.constant 128 : index
    %117 = vector.load %arg16[%c0_59, %c128] : memref<2x1024xbf16, #tpu.memory_space<vmem>>, vector<2x64xbf16>
    tpu.vector_store %arg16[%c0_59, %c128], %116 {strides = array<i32>} : memref<2x1024xbf16, #tpu.memory_space<vmem>>, vector<2x64xbf16>,
    %118 = vector.extract_strided_slice %111 {offsets = [6, 0], sizes = [2, 64], strides = [1, 1]} : vector<32x64xbf16> to vector<2x64xbf16>
    %c0_60 = arith.constant 0 : index
    %c192 = arith.constant 192 : index
    %119 = vector.load %arg16[%c0_60, %c192] : memref<2x1024xbf16, #tpu.memory_space<vmem>>, vector<2x64xbf16>
    tpu.vector_store %arg16[%c0_60, %c192], %118 {strides = array<i32>} : memref<2x1024xbf16, #tpu.memory_space<vmem>>, vector<2x64xbf16>,
    %120 = vector.extract_strided_slice %111 {offsets = [8, 0], sizes = [2, 64], strides = [1, 1]} : vector<32x64xbf16> to vector<2x64xbf16>
    %c0_61 = arith.constant 0 : index
    %c256 = arith.constant 256 : index
    %121 = vector.load %arg16[%c0_61, %c256] : memref<2x1024xbf16, #tpu.memory_space<vmem>>, vector<2x64xbf16>
    tpu.vector_store %arg16[%c0_61, %c256], %120 {strides = array<i32>} : memref<2x1024xbf16, #tpu.memory_space<vmem>>, vector<2x64xbf16>,
    %122 = vector.extract_strided_slice %111 {offsets = [10, 0], sizes = [2, 64], strides = [1, 1]} : vector<32x64xbf16> to vector<2x64xbf16>
    %c0_62 = arith.constant 0 : index
    %c320 = arith.constant 320 : index
    %123 = vector.load %arg16[%c0_62, %c320] : memref<2x1024xbf16, #tpu.memory_space<vmem>>, vector<2x64xbf16>
    tpu.vector_store %arg16[%c0_62, %c320], %122 {strides = array<i32>} : memref<2x1024xbf16, #tpu.memory_space<vmem>>, vector<2x64xbf16>,
    %124 = vector.extract_strided_slice %111 {offsets = [12, 0], sizes = [2, 64], strides = [1, 1]} : vector<32x64xbf16> to vector<2x64xbf16>
    %c0_63 = arith.constant 0 : index
    %c384 = arith.constant 384 : index
    %125 = vector.load %arg16[%c0_63, %c384] : memref<2x1024xbf16, #tpu.memory_space<vmem>>, vector<2x64xbf16>
    tpu.vector_store %arg16[%c0_63, %c384], %124 {strides = array<i32>} : memref<2x1024xbf16, #tpu.memory_space<vmem>>, vector<2x64xbf16>,
    %126 = vector.extract_strided_slice %111 {offsets = [14, 0], sizes = [2, 64], strides = [1, 1]} : vector<32x64xbf16> to vector<2x64xbf16>
    %c0_64 = arith.constant 0 : index
    %c448 = arith.constant 448 : index
    %127 = vector.load %arg16[%c0_64, %c448] : memref<2x1024xbf16, #tpu.memory_space<vmem>>, vector<2x64xbf16>
    tpu.vector_store %arg16[%c0_64, %c448], %126 {strides = array<i32>} : memref<2x1024xbf16, #tpu.memory_space<vmem>>, vector<2x64xbf16>,
    %128 = vector.extract_strided_slice %111 {offsets = [16, 0], sizes = [2, 64], strides = [1, 1]} : vector<32x64xbf16> to vector<2x64xbf16>
    %c0_65 = arith.constant 0 : index
    %c512 = arith.constant 512 : index
    %129 = vector.load %arg16[%c0_65, %c512] : memref<2x1024xbf16, #tpu.memory_space<vmem>>, vector<2x64xbf16>
    tpu.vector_store %arg16[%c0_65, %c512], %128 {strides = array<i32>} : memref<2x1024xbf16, #tpu.memory_space<vmem>>, vector<2x64xbf16>,
    %130 = vector.extract_strided_slice %111 {offsets = [18, 0], sizes = [2, 64], strides = [1, 1]} : vector<32x64xbf16> to vector<2x64xbf16>
    %c0_66 = arith.constant 0 : index
    %c576 = arith.constant 576 : index
    %131 = vector.load %arg16[%c0_66, %c576] : memref<2x1024xbf16, #tpu.memory_space<vmem>>, vector<2x64xbf16>
    tpu.vector_store %arg16[%c0_66, %c576], %130 {strides = array<i32>} : memref<2x1024xbf16, #tpu.memory_space<vmem>>, vector<2x64xbf16>,
    %132 = vector.extract_strided_slice %111 {offsets = [20, 0], sizes = [2, 64], strides = [1, 1]} : vector<32x64xbf16> to vector<2x64xbf16>
    %c0_67 = arith.constant 0 : index
    %c640 = arith.constant 640 : index
    %133 = vector.load %arg16[%c0_67, %c640] : memref<2x1024xbf16, #tpu.memory_space<vmem>>, vector<2x64xbf16>
    tpu.vector_store %arg16[%c0_67, %c640], %132 {strides = array<i32>} : memref<2x1024xbf16, #tpu.memory_space<vmem>>, vector<2x64xbf16>,
    %134 = vector.extract_strided_slice %111 {offsets = [22, 0], sizes = [2, 64], strides = [1, 1]} : vector<32x64xbf16> to vector<2x64xbf16>
    %c0_68 = arith.constant 0 : index
    %c704 = arith.constant 704 : index
    %135 = vector.load %arg16[%c0_68, %c704] : memref<2x1024xbf16, #tpu.memory_space<vmem>>, vector<2x64xbf16>
    tpu.vector_store %arg16[%c0_68, %c704], %134 {strides = array<i32>} : memref<2x1024xbf16, #tpu.memory_space<vmem>>, vector<2x64xbf16>,
    %136 = vector.extract_strided_slice %111 {offsets = [24, 0], sizes = [2, 64], strides = [1, 1]} : vector<32x64xbf16> to vector<2x64xbf16>
    %c0_69 = arith.constant 0 : index
    %c768 = arith.constant 768 : index
    %137 = vector.load %arg16[%c0_69, %c768] : memref<2x1024xbf16, #tpu.memory_space<vmem>>, vector<2x64xbf16>
    tpu.vector_store %arg16[%c0_69, %c768], %136 {strides = array<i32>} : memref<2x1024xbf16, #tpu.memory_space<vmem>>, vector<2x64xbf16>,
    %138 = vector.extract_strided_slice %111 {offsets = [26, 0], sizes = [2, 64], strides = [1, 1]} : vector<32x64xbf16> to vector<2x64xbf16>
    %c0_70 = arith.constant 0 : index
    %c832 = arith.constant 832 : index
    %139 = vector.load %arg16[%c0_70, %c832] : memref<2x1024xbf16, #tpu.memory_space<vmem>>, vector<2x64xbf16>
    tpu.vector_store %arg16[%c0_70, %c832], %138 {strides = array<i32>} : memref<2x1024xbf16, #tpu.memory_space<vmem>>, vector<2x64xbf16>,
    %140 = vector.extract_strided_slice %111 {offsets = [28, 0], sizes = [2, 64], strides = [1, 1]} : vector<32x64xbf16> to vector<2x64xbf16>
    %c0_71 = arith.constant 0 : index
    %c896 = arith.constant 896 : index
    %141 = vector.load %arg16[%c0_71, %c896] : memref<2x1024xbf16, #tpu.memory_space<vmem>>, vector<2x64xbf16>
    tpu.vector_store %arg16[%c0_71, %c896], %140 {strides = array<i32>} : memref<2x1024xbf16, #tpu.memory_space<vmem>>, vector<2x64xbf16>,
    %142 = vector.extract_strided_slice %111 {offsets = [30, 0], sizes = [2, 64], strides = [1, 1]} : vector<32x64xbf16> to vector<2x64xbf16>
    %c0_72 = arith.constant 0 : index
    %c960 = arith.constant 960 : index
    %143 = vector.load %arg16[%c0_72, %c960] : memref<2x1024xbf16, #tpu.memory_space<vmem>>, vector<2x64xbf16>
    tpu.vector_store %arg16[%c0_72, %c960], %142 {strides = array<i32>} : memref<2x1024xbf16, #tpu.memory_space<vmem>>, vector<2x64xbf16>,
    %c0_73 = arith.constant 0 : index
    %c0_74 = arith.constant 0 : index
    %144 = vector.load %arg16[%c0_73, %c0_74] : memref<2x1024xbf16, #tpu.memory_space<vmem>>, vector<2x1024xbf16>
    %c0_75 = arith.constant 0 : index
    %c0_76 = arith.constant 0 : index
    %145 = vector.load %arg8[%c0_75, %c0_76] : memref<1024x32xbf16, #tpu.memory_space<vmem>>, vector<1024x32xbf16>
    %cst_77 = arith.constant dense<0.000000e+00> : vector<2x32xf32>
    %146 = tpu.matmul %144, %145, %cst_77 {dimension_numbers = #tpu.dot_dimension_numbers<[1], [0], [0], [1], [0, 0, 1, 1], [], []>} : vector<2x1024xbf16>, vector<1024x32xbf16>, vector<2x32xf32> -> vector<2x32xf32>
    %c0_78 = arith.constant 0 : index
    %c0_79 = arith.constant 0 : index
    %147 = vector.load %arg9[%c0_78, %c0_79] : memref<1x32xf32, #tpu.memory_space<vmem>>, vector<1x32xf32>
    %148 = vector.broadcast %147 : vector<1x32xf32> to vector<2x32xf32>
    %149 = arith.addf %146, %148 : vector<2x32xf32>
    %cst_80 = arith.constant 0.000000e+00 : f32
    %150 = vector.broadcast %cst_80 : f32 to vector<2x32xf32>
    %151 = arith.maximumf %149, %150 : vector<2x32xf32>
    %152 = arith.truncf %151 : vector<2x32xf32> to vector<2x32xbf16>
    %c0_81 = arith.constant 0 : index
    %c0_82 = arith.constant 0 : index
    %153 = vector.load %arg10[%c0_81, %c0_82] : memref<32x10xbf16, #tpu.memory_space<vmem>>, vector<32x10xbf16>
    %cst_83 = arith.constant dense<0.000000e+00> : vector<2x10xf32>
    %154 = tpu.matmul %152, %153, %cst_83 {dimension_numbers = #tpu.dot_dimension_numbers<[1], [0], [0], [1], [0, 0, 1, 1], [], []>} : vector<2x32xbf16>, vector<32x10xbf16>, vector<2x10xf32> -> vector<2x10xf32>
    %c0_84 = arith.constant 0 : index
    %c0_85 = arith.constant 0 : index
    %155 = vector.load %arg11[%c0_84, %c0_85] : memref<1x10xf32, #tpu.memory_space<vmem>>, vector<1x10xf32>
    %156 = vector.broadcast %155 : vector<1x10xf32> to vector<2x10xf32>
    %157 = arith.addf %154, %156 : vector<2x10xf32>
    %158 = vector.shape_cast %157 : vector<2x10xf32> to vector<1x2x10xf32>
    %c0_86 = arith.constant 0 : index
    %c0_87 = arith.constant 0 : index
    %c0_88 = arith.constant 0 : index
    %159 = vector.load %arg12[%c0_86, %c0_87, %c0_88] : memref<1x2x10xf32, #tpu.memory_space<vmem>>, vector<1x2x10xf32>
    tpu.vector_store %arg12[%c0_86, %c0_87, %c0_88], %158 {strides = array<i32>} : memref<1x2x10xf32, #tpu.memory_space<vmem>>, vector<1x2x10xf32>,
    return
  }
  func.func @transform_0(%arg0: i32) -> (i32, i32) {
    %c0_i32 = arith.constant 0 : i32
    %c0_i32_0 = arith.constant 0 : i32
    return %c0_i32, %arg0 : i32, i32
  }
  func.func @transform_1(%arg0: i32) -> (i32, i32) {
    %c0_i32 = arith.constant 0 : i32
    %c0_i32_0 = arith.constant 0 : i32
    %c0_i32_1 = arith.constant 0 : i32
    return %c0_i32, %c0_i32_0 : i32, i32
  }
  func.func @transform_2(%arg0: i32) -> (i32, i32) {
    %c0_i32 = arith.constant 0 : i32
    %c0_i32_0 = arith.constant 0 : i32
    %c0_i32_1 = arith.constant 0 : i32
    return %c0_i32, %c0_i32_0 : i32, i32
  }
  func.func @transform_3(%arg0: i32) -> (i32, i32) {
    %c0_i32 = arith.constant 0 : i32
    %c0_i32_0 = arith.constant 0 : i32
    %c0_i32_1 = arith.constant 0 : i32
    return %c0_i32, %c0_i32_0 : i32, i32
  }
  func.func @transform_4(%arg0: i32) -> (i32, i32) {
    %c0_i32 = arith.constant 0 : i32
    %c0_i32_0 = arith.constant 0 : i32
    %c0_i32_1 = arith.constant 0 : i32
    return %c0_i32, %c0_i32_0 : i32, i32
  }
  func.func @transform_5(%arg0: i32) -> (i32, i32) {
    %c0_i32 = arith.constant 0 : i32
    %c0_i32_0 = arith.constant 0 : i32
    %c0_i32_1 = arith.constant 0 : i32
    return %c0_i32, %c0_i32_0 : i32, i32
  }
  func.func @transform_6(%arg0: i32) -> (i32, i32) {
    %c0_i32 = arith.constant 0 : i32
    %c0_i32_0 = arith.constant 0 : i32
    %c0_i32_1 = arith.constant 0 : i32
    return %c0_i32, %c0_i32_0 : i32, i32
  }
  func.func @transform_7(%arg0: i32) -> (i32, i32) {
    %c0_i32 = arith.constant 0 : i32
    %c0_i32_0 = arith.constant 0 : i32
    %c0_i32_1 = arith.constant 0 : i32
    return %c0_i32, %c0_i32_0 : i32, i32
  }
  func.func @transform_8(%arg0: i32) -> (i32, i32) {
    %c0_i32 = arith.constant 0 : i32
    %c0_i32_0 = arith.constant 0 : i32
    %c0_i32_1 = arith.constant 0 : i32
    return %c0_i32, %c0_i32_0 : i32, i32
  }
  func.func @transform_9(%arg0: i32) -> (i32, i32) {
    %c0_i32 = arith.constant 0 : i32
    %c0_i32_0 = arith.constant 0 : i32
    %c0_i32_1 = arith.constant 0 : i32
    return %c0_i32, %c0_i32_0 : i32, i32
  }
  func.func @transform_10(%arg0: i32) -> (i32, i32) {
    %c0_i32 = arith.constant 0 : i32
    %c0_i32_0 = arith.constant 0 : i32
    %c0_i32_1 = arith.constant 0 : i32
    return %c0_i32, %c0_i32_0 : i32, i32
  }
  func.func @transform_11(%arg0: i32) -> (i32, i32, i32) {
    %c0_i32 = arith.constant 0 : i32
    %c0_i32_0 = arith.constant 0 : i32
    %c0_i32_1 = arith.constant 0 : i32
    return %arg0, %c0_i32, %c0_i32_0 : i32, i32, i32
  }
}

</mosaic_0001>

<bundles_post_ra>
// kernel: cnn_forward.1
= control target key start
LH: loop header
LB: loop body
LE: loop exit
PB: predicated region body
PF: predicated region fallthrough
CT: control target
= control target key end

     0   :  { %s3079_s23 = smov 1   ;;  %s3080_s24 = smov 18   ;;  %v3087_v14 = vmov 0   ;;  %s4005_s0 = inlined_call_operand.vmem [shape: f32[4,768], index: 0, kind: input, shape index: {}]   ;;  %s4006_s1 = inlined_call_operand.vmem [shape: bf16[4,36], index: 1, kind: input, shape index: {}]   ;;  %s4007_s2 = inlined_call_operand.vmem [shape: f32[4,1], index: 2, kind: input, shape index: {}]   ;;  %s4008_s3 = inlined_call_operand.vmem [shape: bf16[324,64], index: 3, kind: input, shape index: {}]   ;;  %s4009_s4 = inlined_call_operand.vmem [shape: f32[9,64], index: 4, kind: input, shape index: {}]   ;;  %s4010_s5 = inlined_call_operand.vmem [shape: bf16[32,72], index: 5, kind: input, shape index: {}]   ;;  %s4011_s6 = inlined_call_operand.vmem [shape: f32[32,1], index: 6, kind: input, shape index: {}]   ;;  %s4012_s7 = inlined_call_operand.vmem [shape: bf16[1024,32], index: 7, kind: input, shape index: {}]   ;;  %s4013_s8 = inlined_call_operand.vmem [shape: f32[1,32], index: 8, kind: input, shape index: {}]   ;;  %s4014_s9 = inlined_call_operand.vmem [shape: bf16[32,10], index: 9, kind: input, shape index: {}]   ;;  %s4015_s10 = inlined_call_operand.vmem [shape: f32[1,10], index: 10, kind: input, shape index: {}]   ;;  %s4016_s11 = inlined_call_operand.hbm [shape: f32[1,2,10], index: 11, kind: output, shape index: {}]  }
   0x1   :  { %v40_v0 = vld [vmem:[%s4005_s0] sm:$0xff]  ;;  %v42_v1 = vld [vmem:[%s4005_s0 + $0x10] sm:$0xff]  ;;  %v41_v4 = vld [vmem:[%s4005_s0 + $0x8] sm:$0xff]  ;;  %s3081_s25 = smov 19   ;;  %s3082_s26 = smov 17   ;;  %613 = vmatprep.mubr.bf16.mxu0 %v3087_v14  ;;  %654 = vmatprep.mubr.bf16.mxu1 %v3087_v14 }
   0x2   :  { %v46_v2 = vcombine.high %v40_v0, %v40_v0  ;;  %v48_v3 = vcombine.high %v42_v1, %v42_v1  ;;  %v47_v7 = vcombine.high %v41_v4, %v41_v4  ;;  %s3083_s0 = smov 127   ;;  %s3084_s27 = smov 110   ;;  %2906 = vset.pattern.permute.xlu0 %v3087_v14  ;;  %2932 = vset.pattern.permute.xlu1 %v3087_v14  ;;  %v477_v15 = vld [vmem:[%s4007_s2] sm:$0xf] }
   0x3   :  { %s3085_s28 = smov 111   ;;  %s3086_s29 = smov 109  }
   0x4   :  { %v2806_v5 = vpack.i.bf16 %v46_v2, %v40_v0  ;;  %v2811_v6 = vpack.i.bf16 %v41_v4, %v48_v3  ;;  %v2540_v8 = vpack.c.bf16 %v46_v2, %v40_v0  ;;  %v2841_v9 = vpack.i.bf16 %v47_v7, %v41_v4 }
   0x5   :  { %v2871_v10 = vpack.i.bf16 %v42_v1, %v47_v7  ;;  %v2541_v11 = vpack.c.bf16 %v47_v7, %v41_v4  ;;  %v2542_v12 = vpack.c.bf16 %v48_v3, %v42_v1  ;;  %v2891_v13 = vpack.i.bf16 %v48_v3, %v42_v1 }
   0x6   :  { %2807 = vrot.lane.b32.xlu1 %v2806_v5, %s3079_s23  ;;  %2797 = vrot.lane.b32.xlu0 %v2806_v5, %s3080_s24  ;;  %268 = vst [vmem:[#allocation2 + $0x30] sm:$0x33] %v2540_v8 }
   0x7   :  { %269 = vst [vmem:[#allocation2 + $0x38] sm:$0x33] %v2541_v11  ;;  %270 = vst [vmem:[#allocation2 + $0x40] sm:$0x33] %v2542_v12 }
   0xa   :  { %2812 = vrot.lane.b32.xlu1 %v2811_v6, %s3079_s23  ;;  %2802 = vrot.lane.b32.xlu0 %v2811_v6, %s3080_s24 }
   0xe   :  { %2822 = vrot.lane.b32.xlu1 %v2811_v6, %s3081_s25  ;;  %2817 = vrot.lane.b32.xlu0 %v2806_v5, %s3081_s25 }
  0x12   :  { %2832 = vrot.lane.b32.xlu1 %v2811_v6, %s3082_s26  ;;  %2827 = vrot.lane.b32.xlu0 %v2806_v5, %s3082_s26 }
  0x16   :  { %2842 = vrot.lane.b32.xlu1 %v2841_v9, %s3083_s0  ;;  %2837 = vrot.lane.b32.xlu0 %v2806_v5, %s3083_s0 }
  0x1a   :  { %2852 = vrot.lane.b32.xlu1 %v2841_v9, %s3084_s27  ;;  %2847 = vrot.lane.b32.xlu0 %v2806_v5, %s3084_s27 }
  0x1e   :  { %324 = vrot.lane.b32.xlu1 %v41_v4, %s3085_s28  ;;  %2857 = vrot.lane.b32.xlu0 %v2806_v5, %s3085_s28 }
  0x22   :  { %419 = vrot.lane.b32.xlu1 %v41_v4, %s3086_s29  ;;  %2862 = vrot.lane.b32.xlu0 %v2806_v5, %s3086_s29 }
  0x26   :  { %2872 = vrot.lane.b32.xlu1 %v2871_v10, %s3079_s23  ;;  %2867 = vrot.lane.b32.xlu0 %v2871_v10, %s3080_s24 }
  0x2a   :  { %2882 = vrot.lane.b32.xlu1 %v2871_v10, %s3082_s26  ;;  %2877 = vrot.lane.b32.xlu0 %v2871_v10, %s3081_s25 }
  0x2e   :  { %2892 = vrot.lane.b32.xlu1 %v2891_v13, %s3084_s27  ;;  %2887 = vrot.lane.b32.xlu0 %v2891_v13, %s3083_s0 }
  0x32   :  { %330 = vrot.lane.b32.xlu1 %v48_v3, %s3085_s28  ;;  %2897 = vrot.lane.b32.xlu0 %v2871_v10, %s3085_s28 }
  0x36   :  { %425 = vrot.lane.b32.xlu1 %v48_v3, %s3086_s29  ;;  %2902 = vrot.lane.b32.xlu0 %v2871_v10, %s3086_s29 }
  0x3a   :  { %480 = vperm.xlu0 %2906, %v477_v15  }
  0x3b   :  { %16 = vsyncpa [#allocation7], 0  ;;  %v64_v16 = vlaneseq  ;;  %vm562_vm8 = vcmask 1041408   ;;  %vm558_vm9 = vcmask 293888   ;;  %vm3089_vm10 = vmmov 0   ;;  %s3090_s17 = smov 64  }
  0x3c   :  { %vm925_vm11 = vcmask 556032   ;;  %vm1012_vm12 = vcmask 519168   ;;  %s3091_s18 = smov 55   ;;  %s3092_s19 = smov 57   ;;  %vm1104_vm13 = vcmask 1048064   ;;  %vm1328_vm14 = vcmask 588800  }
  0x3d   :  { %v3193_v17 = vand.u32 127, %v64_v16  ;;  %s3093_s20 = smov 8   ;;  %s3094_s21 = smov 56   ;;  %vm1335_vm15 = vcmask 1043456  }
  0x3e   :  { %s3096_s22 = smov 7   ;;  %s3097_s26 = smov 9  }
  0x3f   :  { %vm207_vm0 = vcmp.lt.s32.totalorder %v3193_v17, 1  ;;  %vm112_vm1 = vcmp.lt.s32.totalorder %v3193_v17, 18  ;;  %vm66_vm2 = vcmp.lt.s32.totalorder %v3193_v17, 19  ;;  %vm161_vm3 = vcmp.lt.s32.totalorder %v3193_v17, 17  ;;  %s3098_s28 = smov 73   ;;  %s3100_s29 = smov 71  }
  0x40   :  { %vm283_vm4 = vcmp.lt.s32.totalorder %v3193_v17, 127  ;;  %vm378_vm5 = vcmp.lt.s32.totalorder %v3193_v17, 110  ;;  %vm332_vm6 = vcmp.lt.s32.totalorder %v3193_v17, 111  ;;  %vm427_vm7 = vcmp.lt.s32.totalorder %v3193_v17, 109  ;;  %s3101_s30 = smov 65   ;;  %s3102_s12 = smov 121  }
  0x41   :  { %s3103_s2 = smov 120   ;;  %s3104_s13 = smov 119  }
  0x78   :  { %v3195_v18 = vpop.permute.xlu1 %2807  ;;  %v3197_v19 = vpop.permute.xlu0 %2797 }
  0x79   :  { %v2810_v20 = vunpack.i.h.bf16 %v3195_v18  ;;  %v2809_v21 = vunpack.i.l.bf16 %v3195_v18  ;;  %v2800_v22 = vunpack.i.h.bf16 %v3197_v19  ;;  %v2799_v23 = vunpack.i.l.bf16 %v3197_v19 }
  0x7b   :  { %v212_v26 = vsel %vm207_vm0, %v2809_v21, %v2810_v20  ;;  %v117_v29 = vsel %vm112_vm1, %v2799_v23, %v2800_v22 }
  0x7c   :  { %v3205_v24 = vpop.permute.xlu1 %2812  ;;  %v3207_v25 = vpop.permute.xlu0 %2802 }
  0x7d   :  { %v2814_v27 = vunpack.i.l.bf16 %v3205_v24  ;;  %v2804_v28 = vunpack.i.l.bf16 %v3207_v25  ;;  %v2815_v15 = vunpack.i.h.bf16 %v3205_v24 }
  0x7f   :  { %v213_v30 = vsel %vm207_vm0, %v2814_v27, %v2809_v21  ;;  %v118_v31 = vsel %vm112_vm1, %v2804_v28, %v2799_v23  ;;  %v2805_v21 = vunpack.i.h.bf16 %v3207_v25 }
  0x80   :  { %v2537_v32 = vpack.c.bf16 %v212_v26, %v213_v30  ;;  %v2531_v33 = vpack.c.bf16 %v117_v29, %v118_v31  ;;  %v3227_v34 = vpop.permute.xlu1 %2822  ;;  %v3230_v35 = vpop.permute.xlu0 %2817 }
  0x81   :  { %v2824_v36 = vunpack.i.l.bf16 %v3227_v34  ;;  %v2820_v37 = vunpack.i.h.bf16 %v3230_v35  ;;  %v2819_v38 = vunpack.i.l.bf16 %v3230_v35 }
  0x82   :  { %v235_v39 = vrot.slane %v2537_v32, 6  ;;  %v140_v40 = vrot.slane %v2531_v33, 6  ;;  %v2825_v32 = vunpack.i.h.bf16 %v3227_v34 }
  0x83   :  { %v71_v41 = vsel %vm66_vm2, %v2819_v38, %v2820_v37  ;;  %v72_v42 = vsel %vm66_vm2, %v2824_v36, %v2819_v38 }
  0x84   :  { %241 = vst [vmem:[#allocation2 + $0x18] sm:$0xcc] %v235_v39  ;;  %146 = vst [vmem:[#allocation2] sm:$0xcc] %v140_v40  ;;  %v2528_v43 = vpack.c.bf16 %v71_v41, %v72_v42  ;;  %v3243_v44 = vpop.permute.xlu1 %2832  ;;  %v3246_v45 = vpop.permute.xlu0 %2827  ;;  %v211_v41 = vsel %vm207_vm0, %v2810_v20, %v2815_v15  ;;  %v116_v42 = vsel %vm112_vm1, %v2800_v22, %v2805_v21 }
  0x85   :  { %v2834_v46 = vunpack.i.l.bf16 %v3243_v44  ;;  %v2830_v47 = vunpack.i.h.bf16 %v3246_v45  ;;  %v2829_v48 = vunpack.i.l.bf16 %v3246_v45  ;;  %v2835_v33 = vunpack.i.h.bf16 %v3243_v44 }
  0x86   :  { %97 = vst [vmem:[#allocation2] sm:$0x33] %v2528_v43  ;;  %v70_v18 = vsel %vm66_vm2, %v2820_v37, %v2825_v32 }
  0x87   :  { %v166_v49 = vsel %vm161_vm3, %v2829_v48, %v2830_v47  ;;  %v167_v50 = vsel %vm161_vm3, %v2834_v46, %v2829_v48  ;;  %v165_v19 = vsel %vm161_vm3, %v2830_v47, %v2835_v33 }
  0x88   :  { %v2534_v51 = vpack.c.bf16 %v166_v49, %v167_v50  ;;  %v3260_v52 = vpop.permute.xlu1 %2842  ;;  %v3262_v53 = vpop.permute.xlu0 %2837 }
  0x89   :  { %v2844_v54 = vunpack.i.l.bf16 %v3260_v52  ;;  %v2840_v55 = vunpack.i.h.bf16 %v3262_v53  ;;  %v2839_v56 = vunpack.i.l.bf16 %v3262_v53  ;;  %v2845_v38 = vunpack.i.h.bf16 %v3260_v52 }
  0x8a   :  { %192 = vst [vmem:[#allocation2 + $0x18] sm:$0x33] %v2534_v51 }
  0x8b   :  { %v287_v57 = vsel %vm283_vm4, %v2840_v55, %v2844_v54  ;;  %v288_v58 = vsel %vm283_vm4, %v2839_v56, %v2840_v55  ;;  %v3342_v20 = vsel %vm283_vm4, %v2844_v54, %v2845_v38 }
  0x8c   :  { %v2543_v59 = vpack.c.bf16 %v287_v57, %v288_v58  ;;  %v3274_v60 = vpop.permute.xlu1 %2852  ;;  %v3276_v61 = vpop.permute.xlu0 %2847 }
  0x8d   :  { %v2854_v62 = vunpack.i.l.bf16 %v3274_v60  ;;  %v2850_v63 = vunpack.i.h.bf16 %v3276_v61  ;;  %v2849_v0 = vunpack.i.l.bf16 %v3276_v61  ;;  %v2855_v22 = vunpack.i.h.bf16 %v3274_v60 }
  0x8e   :  { %v311_v1 = vrot.slane %v2543_v59, 6 }
  0x8f   :  { %v382_v2 = vsel %vm378_vm5, %v2850_v63, %v2854_v62  ;;  %v383_v3 = vsel %vm378_vm5, %v2849_v0, %v2850_v63 }
  0x90   :  { %317 = vst [vmem:[#allocation2 + $0x30] sm:$0xcc] %v311_v1  ;;  %v2549_v4 = vpack.c.bf16 %v382_v2, %v383_v3  ;;  %v3289_v5 = vpop.permute.xlu1 %324  ;;  %v3292_v6 = vpop.permute.xlu0 %2857 }
  0x91   :  { %v2860_v7 = vunpack.i.h.bf16 %v3292_v6  ;;  %v2859_v8 = vunpack.i.l.bf16 %v3292_v6  ;;  %v2936_v9 = vld [vmem:[#allocation2 + $0x4] ss:$24 sps:$4 sm:$0xff]   ;;  %v2938_v10 = vld [vmem:[#allocation2] ss:$24 sps:$4 sm:$0xff]  }
  0x92   :  { %v406_v11 = vrot.slane %v2549_v4, 6  ;;  %581 = vmatprep.subr.bf16.mxu0 %v2936_v9 }
  0x93   :  { %v336_v12 = vsel %vm332_vm6, %v2860_v7, %v3289_v5  ;;  %v337_v13 = vsel %vm332_vm6, %v2859_v8, %v2860_v7  ;;  %582 = vmatpush1.bf16.msra.mxu0 %v2938_v10 }
  0x94   :  { %412 = vst [vmem:[#allocation2 + $0x48] sm:$0xcc] %v406_v11  ;;  %v2546_v23 = vpack.c.bf16 %v336_v12, %v337_v13  ;;  %v3305_v26 = vpop.permute.xlu1 %419  ;;  %v3308_v29 = vpop.permute.xlu0 %2862 }
  0x95   :  { %v2865_v30 = vunpack.i.h.bf16 %v3308_v29  ;;  %v2864_v31 = vunpack.i.l.bf16 %v3308_v29 }
  0x96   :  { %363 = vst [vmem:[#allocation2 + $0x48] sm:$0x33] %v2546_v23 }
  0x97   :  { %v431_v39 = vsel %vm427_vm7, %v2865_v30, %v3305_v26  ;;  %v432_v40 = vsel %vm427_vm7, %v2864_v31, %v2865_v30 }
  0x98   :  { %v2552_v43 = vpack.c.bf16 %v431_v39, %v432_v40  ;;  %v2873_v48 = vpop.permute.xlu1 %2872  ;;  %v2868_v49 = vpop.permute.xlu0 %2867 }
  0x99   :  { %v2875_v50 = vunpack.i.h.bf16 %v2873_v48  ;;  %v2874_v51 = vunpack.i.l.bf16 %v2873_v48  ;;  %v2870_v55 = vunpack.i.h.bf16 %v2868_v49  ;;  %v2869_v57 = vunpack.i.l.bf16 %v2868_v49 }
  0x9a   :  { %458 = vst [vmem:[#allocation2 + $0x60] sm:$0x33] %v2552_v43 }
  0x9b   :  { %v208_v35 = vsel %vm207_vm0, %v2875_v50, %v2814_v27  ;;  %v209_v37 = vsel %vm207_vm0, %v2874_v51, %v2875_v50  ;;  %v210_v45 = vsel %vm207_vm0, %v2815_v15, %v2874_v51  ;;  %v113_v47 = vsel %vm112_vm1, %v2870_v55, %v2804_v28 }
  0x9c   :  { %v2538_v54 = vpack.c.bf16 %v210_v45, %v211_v41  ;;  %v2539_v58 = vpack.c.bf16 %v208_v35, %v209_v37  ;;  %v114_v59 = vsel %vm112_vm1, %v2869_v57, %v2870_v55  ;;  %v115_v24 = vsel %vm112_vm1, %v2805_v21, %v2869_v57  ;;  %v2883_v27 = vpop.permute.xlu1 %2882  ;;  %v2878_v63 = vpop.permute.xlu0 %2877 }
  0x9d   :  { %v2532_v1 = vpack.c.bf16 %v115_v24, %v116_v42  ;;  %v2533_v2 = vpack.c.bf16 %v113_v47, %v114_v59  ;;  %v2885_v3 = vunpack.i.h.bf16 %v2883_v27  ;;  %v2884_v4 = vunpack.i.l.bf16 %v2883_v27  ;;  %v2939_v7 = vld [vmem:[#allocation2 + $0x34] ss:$24 sps:$4 sm:$0xff]   ;;  %v2941_v9 = vld [vmem:[#allocation2 + $0x30] ss:$24 sps:$4 sm:$0xff]  }
  0x9e   :  { %v236_v25 = vrot.slane %v2538_v54, 6  ;;  %v237_v10 = vrot.slane %v2539_v58, 6  ;;  %v2880_v11 = vunpack.i.h.bf16 %v2878_v63  ;;  %v2879_v28 = vunpack.i.l.bf16 %v2878_v63  ;;  %583 = vmatprep.subr.bf16.mxu0 %v2939_v7 }
  0x9f   :  { %v141_v12 = vrot.slane %v2532_v1, 6  ;;  %v142_v13 = vrot.slane %v2533_v2, 6  ;;  %v162_v15 = vsel %vm161_vm3, %v2885_v3, %v2834_v46  ;;  %v163_v21 = vsel %vm161_vm3, %v2884_v4, %v2885_v3  ;;  %584 = vmatpush1.bf16.msra.mxu0 %v2941_v9  ;;  %v461_v1 = vld [vmem:[%s4006_s1] sm:$0x3] }
  0xa0   :  { %242 = vst [vmem:[#allocation2 + $0x20] sm:$0xcc] %v236_v25  ;;  %243 = vst [vmem:[#allocation2 + $0x28] sm:$0xcc] %v237_v10  ;;  %v164_v23 = vsel %vm161_vm3, %v2835_v33, %v2884_v4  ;;  %v2536_v30 = vpack.c.bf16 %v162_v15, %v163_v21  ;;  %v67_v39 = vsel %vm66_vm2, %v2880_v11, %v2824_v36  ;;  %v2893_v40 = vpop.permute.xlu1 %2892  ;;  %v2888_v46 = vpop.permute.xlu0 %2887  ;;  %vm1394_vm0 = vcmask 516096  }
  0xa1   :  { %v68_v44 = vsel %vm66_vm2, %v2879_v28, %v2880_v11  ;;  %147 = vst [vmem:[#allocation2 + $0x8] sm:$0xcc] %v141_v12  ;;  %148 = vst [vmem:[#allocation2 + $0x10] sm:$0xcc] %v142_v13  ;;  %v2535_v41 = vpack.c.bf16 %v164_v23, %v165_v19  ;;  %v69_v42 = vsel %vm66_vm2, %v2825_v32, %v2879_v28  ;;  %v2895_v43 = vunpack.i.h.bf16 %v2893_v40  ;;  %v474_v48 = vld [vmem:[#allocation2 + $0x60] sm:$0x33] }
  0xa2   :  { %v2530_v33 = vpack.c.bf16 %v67_v39, %v68_v44  ;;  %194 = vst [vmem:[#allocation2 + $0x28] sm:$0x33] %v2536_v30  ;;  %v2529_v34 = vpack.c.bf16 %v69_v42, %v70_v18  ;;  %v2894_v49 = vunpack.i.l.bf16 %v2893_v40  ;;  %v2890_v36 = vunpack.i.h.bf16 %v2888_v46 }
  0xa3   :  { %v2889_v50 = vunpack.i.l.bf16 %v2888_v46  ;;  %v381_v51 = vsel %vm378_vm5, %v2854_v62, %v2855_v22  ;;  %193 = vst [vmem:[#allocation2 + $0x20] sm:$0x33] %v2535_v41  ;;  %v384_v32 = vsel %vm378_vm5, %v2895_v43, %v2849_v0  ;;  %v2405_v55 = vcombine.high %v474_v48, %v474_v48 }
  0xa4   :  { %99 = vst [vmem:[#allocation2 + $0x10] sm:$0x33] %v2530_v33  ;;  %v2404_v57 = vcombine.low %v474_v48, %v474_v48  ;;  %98 = vst [vmem:[#allocation2 + $0x8] sm:$0x33] %v2529_v34  ;;  %v379_v18 = vsel %vm378_vm5, %v2894_v49, %v2895_v43  ;;  %v380_v19 = vsel %vm378_vm5, %v2855_v22, %v2894_v49  ;;  %v331_v62 = vpop.permute.xlu1 %330  ;;  %v2898_v35 = vpop.permute.xlu0 %2897  ;;  %vm1422_vm1 = vcmask 1040896  }
  0xa5   :  { %v284_v60 = vsel %vm283_vm4, %v2889_v50, %v2890_v36  ;;  %v285_v61 = vsel %vm283_vm4, %v2845_v38, %v2889_v50  ;;  %v2550_v0 = vpack.c.bf16 %v380_v19, %v381_v51  ;;  %v2551_v37 = vpack.c.bf16 %v384_v32, %v379_v18  ;;  %2410 = vmatprep.subr.msk.bf16.mxu0 %vm562_vm8, %v2405_v55 }
  0xa6   :  { %v289_v45 = vsel %vm283_vm4, %v2890_v36, %v2839_v56  ;;  %v2544_v47 = vpack.c.bf16 %v285_v61, %v3342_v20  ;;  %v338_v52 = vsel %vm332_vm6, %v331_v62, %v2859_v8  ;;  %v2900_v38 = vunpack.i.h.bf16 %v2898_v35 }
  0xa7   :  { %v2545_v22 = vpack.c.bf16 %v289_v45, %v284_v60  ;;  %v2899_v54 = vunpack.i.l.bf16 %v2898_v35  ;;  %v407_v58 = vrot.slane %v2550_v0, 6  ;;  %v408_v59 = vrot.slane %v2551_v37, 6 }
  0xa8   :  { %v312_v24 = vrot.slane %v2544_v47, 6  ;;  %v564_v53 = vsel %vm562_vm8, %v2404_v57, 0  ;;  %v333_v56 = vsel %vm332_vm6, %v2900_v38, %v331_v62  ;;  %v426_v8 = vpop.permute.xlu1 %425  ;;  %v2903_v63 = vpop.permute.xlu0 %2902  ;;  %vm2305_vm2 = vcmask 261120  }
  0xa9   :  { %v313_v27 = vrot.slane %v2545_v22, 6  ;;  %v334_v20 = vsel %vm332_vm6, %v2899_v54, %v2900_v38  ;;  %v335_v6 = vsel %vm332_vm6, %v3289_v5, %v2899_v54  ;;  %586 = vmatpush1.bf16.msra.mxu0 %v564_v53  ;;  %413 = vst [vmem:[#allocation2 + $0x50] sm:$0xcc] %v407_v58  ;;  %414 = vst [vmem:[#allocation2 + $0x58] sm:$0xcc] %v408_v59  ;;  %v2905_v4 = vunpack.i.h.bf16 %v2903_v63  ;;  %v3462_v54 = vld [vmem:[%s4008_s3 + $0x40] sm:$0xff]  }
  0xaa   :  { %318 = vst [vmem:[#allocation2 + $0x38] sm:$0xcc] %v312_v24  ;;  %v2547_v2 = vpack.c.bf16 %v334_v20, %v335_v6  ;;  %v2548_v3 = vpack.c.bf16 %v338_v52, %v333_v56  ;;  %v2904_v7 = vunpack.i.l.bf16 %v2903_v63  ;;  %v433_v5 = vsel %vm427_vm7, %v426_v8, %v2864_v31  ;;  %v3467_v58 = vld [vmem:[%s4008_s3] sm:$0xff]   ;;  %v3472_v59 = vld [vmem:[%s4008_s3 + $0x48] sm:$0xff]   ;;  %v3497_v6 = vld [vmem:[%s4008_s3 + $0x50] sm:$0xff]  }
  0xab   :  { %319 = vst [vmem:[#allocation2 + $0x40] sm:$0xcc] %v313_v27  ;;  %v2946_v9 = vld [vmem:[#allocation2 + $0x10] ss:$24 sps:$4 sm:$0xff]   ;;  %v428_v25 = vsel %vm427_vm7, %v2905_v4, %v426_v8  ;;  %v2944_v10 = vld [vmem:[#allocation2 + $0xc] ss:$24 sps:$4 sm:$0xff]  }
  0xac   :  { %364 = vst [vmem:[#allocation2 + $0x50] sm:$0x33] %v2547_v2  ;;  %365 = vst [vmem:[#allocation2 + $0x58] sm:$0x33] %v2548_v3  ;;  %2411 = vmatmul.mubr.msk.bf16.vlgmr.msra.gmra.mrb[0].mxu0 %vm558_vm9, %v461_v1  ;;  %v2948_v11 = vld [vmem:[#allocation2 + $0x14] ss:$24 sps:$4 sm:$0xff]   ;;  %v429_v28 = vsel %vm427_vm7, %v2904_v7, %v2905_v4  ;;  %v430_v12 = vsel %vm427_vm7, %v3305_v26, %v2904_v7  ;;  %v2554_v13 = vpack.c.bf16 %v433_v5, %v428_v25 }
  0xad   :  { %v2949_v15 = vld [vmem:[#allocation2 + $0x8] ss:$24 sps:$4 sm:$0xff]   ;;  %695 = vmatprep.mubr.bf16.mxu0 %v3087_v14  ;;  %v2553_v29 = vpack.c.bf16 %v429_v28, %v430_v12  ;;  %622 = vmatprep.subr.bf16.mxu1 %v2944_v10  ;;  %v3088_v24 = vmov 0.0   ;;  %v3520_v2 = vld [vmem:[%s4008_s3 + $0x58] sm:$0xff]   ;;  %v3526_v3 = vld [vmem:[%s4008_s3 + $0x90] sm:$0xff]   ;;  %vm2349_vm3 = vcmask 74752  }
  0xae   :  { %663 = vmatprep.subr.bf16.mxu0 %v2948_v11  ;;  %460 = vst [vmem:[#allocation2 + $0x70] sm:$0x33] %v2554_v13  ;;  %623 = vmatpush1.bf16.msra.mxu1 %v2949_v15  ;;  %v3482_v56 = vld [vmem:[%s4008_s3 + $0x80] sm:$0xff]   ;;  %v3488_v20 = vld [vmem:[%s4008_s3 + $0x8] sm:$0xff]   ;;  %v3533_v4 = vld [vmem:[%s4008_s3 + $0x18] sm:$0xff]  }
  0xaf   :  { %664 = vmatpush1.bf16.msra.mxu0 %v2946_v9  ;;  %459 = vst [vmem:[#allocation2 + $0x68] sm:$0x33] %v2553_v29  ;;  %v3503_v8 = vld [vmem:[%s4008_s3 + $0x88] sm:$0xff]   ;;  %v3539_v7 = vld [vmem:[%s4008_s3 + $0x60] sm:$0xff]   ;;  %v3566_v11 = vld [vmem:[%s4008_s3 + $0x70] sm:$0xff]  }
  0xb0   :  { %v3547_v9 = vld [vmem:[%s4008_s3 + $0x20] sm:$0xff]   ;;  %v3553_v5 = vld [vmem:[%s4008_s3 + $0x68] sm:$0xff]   ;;  %v3571_v28 = vld [vmem:[%s4008_s3 + $0x98] sm:$0xff]  }
  0xb1   :  { %v3559_v25 = vld [vmem:[%s4008_s3 + $0x28] sm:$0xff]   ;;  %v3576_v15 = vld [vmem:[%s4008_s3 + $0x30] sm:$0xff]   ;;  %v2979_v29 = vld [vmem:[%s4008_s3 + $0xa0] ss:$0 sps:$4 sm:$0x33]  }
  0xb3   :  { %v2950_v31 = vld [vmem:[#allocation2 + $0x3c] ss:$24 sps:$4 sm:$0xff]   ;;  %v2952_v21 = vld [vmem:[#allocation2 + $0x40] ss:$24 sps:$4 sm:$0xff]  }
  0xb4   :  { %v2954_v23 = vld [vmem:[#allocation2 + $0x44] ss:$24 sps:$4 sm:$0xff]   ;;  %v2955_v30 = vld [vmem:[#allocation2 + $0x38] ss:$24 sps:$4 sm:$0xff]   ;;  %624 = vmatprep.subr.bf16.mxu1 %v2950_v31 }
  0xb5   :  { %665 = vmatprep.subr.bf16.mxu0 %v2954_v23  ;;  %625 = vmatpush1.bf16.msra.mxu1 %v2955_v30  ;;  %v476_v39 = vld [vmem:[#allocation2 + $0x70] sm:$0x33] }
  0xb6   :  { %666 = vmatpush1.bf16.msra.mxu0 %v2952_v21  ;;  %v475_v26 = vld [vmem:[#allocation2 + $0x68] sm:$0x33]  ;;  %v2409_v44 = vcombine.high %v476_v39, %v476_v39  ;;  %v2408_v40 = vcombine.low %v476_v39, %v476_v39  ;;  %v3588_v21 = vld [vmem:[%s4008_s3 + $0x78] sm:$0xff]  }
  0xb7   :  { %v2407_v14 = vcombine.high %v475_v26, %v475_v26  ;;  %v2406_v46 = vcombine.low %v475_v26, %v475_v26  ;;  %v3593_v26 = vsel %vm562_vm8, %v2979_v29, 0 }
  0xb8   :  { %2414 = vmatprep.subr.msk.bf16.mxu0 %vm562_vm8, %v2409_v44  ;;  %v576_v41 = vsel %vm562_vm8, %v2408_v40, 0  ;;  %v3598_v44 = vld [vmem:[%s4008_s3 + $0x38] sm:$0xff]  }
  0xb9   :  { %2412 = vmatprep.subr.msk.bf16.mxu1 %vm562_vm8, %v2407_v14  ;;  %v570_v42 = vsel %vm562_vm8, %v2406_v46, 0  ;;  %v481_v33 = vpop.permute.xlu0 %480 }
  0xba   :  { %627 = vmatpush1.bf16.msra.mxu1 %v570_v42  ;;  %668 = vmatpush1.bf16.msra.mxu0 %v576_v41 }
  0xbb   :  { %2717 = vmatprep.subr.bf16.mxu0 %v3088_v24  ;;  %2563 = vmatprep.subr.bf16.mxu1 %v3462_v54 }
  0xbd   :  { %2413 = vmatmul.mubr.msk.bf16.vlgmr.msra.gmra.mrb[0].mxu1 %vm558_vm9, %v461_v1  ;;  %2415 = vmatmul.mubr.msk.bf16.vlgmr.msra.gmra.mrb[4].mxu0 %vm558_vm9, %v461_v1  ;;  %v3511_v1 = vld [vmem:[%s4008_s3 + $0x10] sm:$0xff]  }
  0xbe   :  { %2564 = vmatpush3.bf16.msra.mxu1 %v3467_v58  ;;  %2718 = vmatpush3.bf16.msra.mxu0 %v3482_v56 }
  0xbf   :  { %2565 = vmatprep.subr.bf16.mxu1 %v3472_v59  ;;  %2719 = vmatprep.subr.bf16.mxu0 %v3088_v24 }
  0xc0   :  { %2727 = vmatprep.mubr.msk.bf16.mxu0 %vm3089_vm10, %v3088_v24 }
  0xc2   :  { %2566 = vmatpush3.bf16.msra.mxu1 %v3488_v20  ;;  %2720 = vmatpush3.bf16.msra.mxu0 %v3503_v8 }
  0xc3   :  { %2567 = vmatprep.subr.bf16.mxu1 %v3497_v6  ;;  %2721 = vmatprep.subr.bf16.mxu0 %v3088_v24 }
  0xc6   :  { %2568 = vmatpush3.bf16.msra.mxu1 %v3511_v1  ;;  %2722 = vmatpush3.bf16.msra.mxu0 %v3526_v3 }
  0xc7   :  { %2569 = vmatprep.subr.bf16.mxu1 %v3520_v2  ;;  %2723 = vmatprep.subr.bf16.mxu0 %v3088_v24 }
  0xca   :  { %2570 = vmatpush3.bf16.msra.mxu1 %v3533_v4  ;;  %2724 = vmatpush3.bf16.msra.mxu0 %v3571_v28 }
  0xcb   :  { %2571 = vmatprep.subr.bf16.mxu1 %v3539_v7  ;;  %2725 = vmatprep.subr.bf16.mxu0 %v3088_v24 }
  0xce   :  { %2572 = vmatpush3.bf16.msra.mxu1 %v3547_v9  ;;  %2726 = vmatpush3.bf16.msra.mxu0 %v3593_v26 }
  0xcf   :  { %2573 = vmatprep.subr.bf16.mxu1 %v3553_v5  ;;  %2591 = vmatprep.subr.bf16.mxu0 %v3462_v54 }
  0xd2   :  { %2574 = vmatpush3.bf16.msra.mxu1 %v3559_v25 }
  0xd3   :  { %2575 = vmatprep.subr.bf16.mxu1 %v3566_v11 }
  0xd6   :  { %2576 = vmatpush3.bf16.msra.mxu1 %v3576_v15 }
  0xd7   :  { %2577 = vmatprep.subr.bf16.mxu1 %v3588_v21 }
  0xda   :  { %2578 = vmatpush3.bf16.msra.mxu1 %v3598_v44 }
  0xdb   :  { %2731 = vmatprep.subr.bf16.mxu1 %v3088_v24 }
 0x17f   :  { %v615_v43 = vpop.f32.mrb[0].mxu0 }
 0x180   :  { %v3435_v48 = vadd.f32 %v615_v43, %v481_v33  ;;  %v617_v34 = vpop.f32.mrb[1].mxu0 }
 0x181   :  { %v3437_v49 = vadd.f32 %v617_v34, %v481_v33  ;;  %v619_v36 = vpop.f32.mrb[2].mxu0 }
 0x182   :  { %v704_v50 = vmax.f32 %v3435_v48, 0.0  ;;  %v620_v51 = vpop.f32.mrb[3].mxu0 }
 0x183   :  { %v705_v32 = vmax.f32 %v3437_v49, 0.0 }
 0x185   :  { %v2912_v55 = vpack.i.bf16 %v704_v50, %v705_v32 }
 0x187   :  { %2913 = vrot.lane.b32.xlu0 %v2912_v55, %s3083_s0 }
 0x190   :  { %v656_v57 = vpop.f32.mrb[0].mxu1  ;;  %v697_v18 = vpop.f32.mrb[4].mxu0 }
 0x191   :  { %v3446_v19 = vadd.f32 %v656_v57, %v481_v33  ;;  %v658_v60 = vpop.f32.mrb[1].mxu1  ;;  %v699_v61 = vpop.f32.mrb[5].mxu0  ;;  %v3452_v52 = vadd.f32 %v697_v18, %v481_v33 }
 0x192   :  { %v3448_v62 = vadd.f32 %v658_v60, %v481_v33  ;;  %v660_v35 = vpop.f32.mrb[2].mxu1  ;;  %v701_v0 = vpop.f32.mrb[6].mxu0  ;;  %v3476_v27 = vadd.f32 %v699_v61, %v481_v33 }
 0x193   :  { %v706_v37 = vmax.f32 %v3446_v19, 0.0  ;;  %v661_v45 = vpop.f32.mrb[3].mxu1  ;;  %v702_v47 = vpop.f32.mrb[7].mxu0  ;;  %v708_v53 = vmax.f32 %v3452_v52, 0.0 }
 0x194   :  { %v707_v22 = vmax.f32 %v3448_v62, 0.0  ;;  %v709_v63 = vmax.f32 %v3476_v27, 0.0 }
 0x196   :  { %v2907_v38 = vpack.i.bf16 %v707_v22, %v706_v37 }
 0x198   :  { %2908 = vrot.lane.b32.xlu1 %v2907_v38, %s3083_s0 }
 0x19c   :  { %718 = vrot.lane.b32.xlu1 %v708_v53, %s3083_s0 }
 0x1a0   :  { %720 = vrot.lane.b32.xlu1 %v709_v63, %s3083_s0 }
 0x1f9   :  { %v2914_v10 = vpop.permute.xlu0 %2913 }
 0x1fa   :  { %v2916_v12 = vunpack.i.h.bf16 %v2914_v10  ;;  %v2915_v13 = vunpack.i.l.bf16 %v2914_v10 }
 0x1fc   :  { %v726_v23 = vsel %vm283_vm4, %v2916_v12, %v2915_v13 }
 0x1fd   :  { %v728_v41 = vmax.f32 %v704_v50, %v726_v23 }
 0x20a   :  { %v2909_v31 = vpop.permute.xlu1 %2908 }
 0x20b   :  { %v2911_v30 = vunpack.i.h.bf16 %v2909_v31  ;;  %v2910_v39 = vunpack.i.l.bf16 %v2909_v31 }
 0x20d   :  { %v724_v40 = vsel %vm283_vm4, %v2910_v39, %v2911_v30  ;;  %v725_v14 = vsel %vm283_vm4, %v2915_v13, %v2910_v39 }
 0x20e   :  { %v719_v46 = vpop.permute.xlu1 %718  ;;  %v729_v42 = vmax.f32 %v705_v32, %v725_v14  ;;  %v730_v48 = vmax.f32 %v706_v37, %v724_v40 }
 0x20f   :  { %v723_v33 = vsel %vm283_vm4, %v2911_v30, %v719_v46 }
 0x210   :  { %v3619_v43 = vmax.f32 %v707_v22, %v723_v33  ;;  %v2922_v34 = vpack.i.bf16 %v728_v41, %v729_v42 }
 0x212   :  { %v721_v36 = vpop.permute.xlu1 %720  ;;  %2923 = vrot.lane.b32.xlu1 %v2922_v34, %s3084_s27  ;;  %v2917_v49 = vpack.i.bf16 %v3619_v43, %v730_v48 }
 0x213   :  { %v722_v50 = vsel %vm283_vm4, %v719_v46, %v721_v36  ;;  %v727_v51 = vsel %vm283_vm4, %v721_v36, %v2916_v12 }
 0x214   :  { %v732_v32 = vmax.f32 %v708_v53, %v722_v50  ;;  %v733_v55 = vmax.f32 %v709_v63, %v727_v51  ;;  %2918 = vrot.lane.b32.xlu0 %v2917_v49, %s3084_s27 }
 0x216   :  { %v2927_v57 = vpack.i.bf16 %v733_v55, %v732_v32 }
 0x218   :  { %2928 = vrot.lane.b32.xlu0 %v2927_v57, %s3084_s27 }
 0x284   :  { %v2924_v18 = vpop.permute.xlu1 %2923 }
 0x285   :  { %v2926_v19 = vunpack.i.h.bf16 %v2924_v18  ;;  %v2925_v60 = vunpack.i.l.bf16 %v2924_v18 }
 0x286   :  { %v2919_v61 = vpop.permute.xlu0 %2918 }
 0x287   :  { %v750_v62 = vsel %vm378_vm5, %v2926_v19, %v2925_v60  ;;  %v2921_v35 = vunpack.i.h.bf16 %v2919_v61  ;;  %v2920_v0 = vunpack.i.l.bf16 %v2919_v61 }
 0x288   :  { %v752_v37 = vmax.f32 %v728_v41, %v750_v62  ;;  %v1102_v41 = vld [vmem:[%s4009_s4] sm:$0xff] }
 0x289   :  { %v748_v45 = vsel %vm378_vm5, %v2920_v0, %v2921_v35  ;;  %v749_v47 = vsel %vm378_vm5, %v2925_v60, %v2920_v0 }
 0x28a   :  { %v754_v22 = vmax.f32 %v730_v48, %v748_v45  ;;  %v2929_v52 = vpop.permute.xlu0 %2928  ;;  %v753_v38 = vmax.f32 %v729_v42, %v749_v47  ;;  %v799_v10 = vpack.c.bf16 %v752_v37, %v752_v37  ;;  %v2446_v37 = vld [vmem:[%s4009_s4 + $0x8] ss:$0 sm:$0xff]  ;;  %s3099_s4 = smov 72  }
 0x28b   :  { %v2931_v54 = vunpack.i.h.bf16 %v2929_v52  ;;  %v2930_v53 = vunpack.i.l.bf16 %v2929_v52 }
 0x28c   :  { %v801_v27 = vpack.c.bf16 %v754_v22, %v754_v22  ;;  %v800_v63 = vpack.c.bf16 %v753_v38, %v753_v38 }
 0x28d   :  { %v746_v12 = vsel %vm378_vm5, %v2930_v53, %v2931_v54 }
 0x28e   :  { %964 = vmatprep.mubr.bf16.mxu1 %v800_v63  ;;  %2728 = vmatmul.mubr.msk.bf16.vlgmr.msra.gmra.mrb[8].mxu0 %vm925_vm11, %v801_v27  ;;  %v756_v13 = vmax.f32 %v732_v32, %v746_v12 }
 0x28f   :  { %2592 = vmatpush3.bf16.msra.mxu0 %v3467_v58  ;;  %965 = vmatmul.mubr.bf16.vlgmr.msra.gmra.mrb[4].mxu1 %v799_v10  ;;  %v751_v58 = vsel %vm378_vm5, %v2931_v54, %v2926_v19 }
 0x290   :  { %2732 = vmatpush3.bf16.msra.mxu1 %v3482_v56  ;;  %2593 = vmatprep.subr.bf16.mxu0 %v3472_v59  ;;  %v1015_v29 = vpack.c.bf16 %v756_v13, %v756_v13  ;;  %v757_v59 = vmax.f32 %v733_v55, %v751_v58 }
 0x291   :  { %2733 = vmatprep.subr.bf16.mxu1 %v3088_v24  ;;  %2741 = vmatprep.mubr.msk.bf16.mxu1 %vm3089_vm10, %v3088_v24 }
 0x292   :  { %1052 = vmatprep.mubr.bf16.mxu0 %v1015_v29  ;;  %v1016_v56 = vpack.c.bf16 %v757_v59, %v757_v59 }
 0x293   :  { %2594 = vmatpush3.bf16.msra.mxu0 %v3488_v20  ;;  %v747_v20 = vsel %vm378_vm5, %v2921_v35, %v2930_v53 }
 0x294   :  { %2734 = vmatpush3.bf16.msra.mxu1 %v3503_v8  ;;  %2595 = vmatprep.subr.bf16.mxu0 %v3497_v6  ;;  %v755_v6 = vmax.f32 %v3619_v43, %v747_v20 }
 0x295   :  { %2735 = vmatprep.subr.bf16.mxu1 %v3088_v24 }
 0x296   :  { %v1014_v8 = vpack.c.bf16 %v755_v6, %v755_v6 }
 0x297   :  { %2596 = vmatpush3.bf16.msra.mxu0 %v3511_v1 }
 0x298   :  { %2736 = vmatpush3.bf16.msra.mxu1 %v3526_v3  ;;  %2597 = vmatprep.subr.bf16.mxu0 %v3520_v2 }
 0x299   :  { %2737 = vmatprep.subr.bf16.mxu1 %v3088_v24 }
 0x29b   :  { %2598 = vmatpush3.bf16.msra.mxu0 %v3533_v4 }
 0x29c   :  { %2738 = vmatpush3.bf16.msra.mxu1 %v3571_v28  ;;  %2599 = vmatprep.subr.bf16.mxu0 %v3539_v7 }
 0x29d   :  { %2739 = vmatprep.subr.bf16.mxu1 %v3088_v24 }
 0x29f   :  { %2600 = vmatpush3.bf16.msra.mxu0 %v3547_v9 }
 0x2a0   :  { %2740 = vmatpush3.bf16.msra.mxu1 %v3593_v26  ;;  %2601 = vmatprep.subr.bf16.mxu0 %v3553_v5 }
 0x2a3   :  { %2602 = vmatpush3.bf16.msra.mxu0 %v3559_v25  ;;  %2742 = vmatmul.mubr.msk.bf16.vlgmr.msra.gmra.mrb[8].mxu1 %vm925_vm11, %v1016_v56 }
 0x2a4   :  { %2603 = vmatprep.subr.bf16.mxu0 %v3566_v11 }
 0x2a7   :  { %2604 = vmatpush3.bf16.msra.mxu0 %v3576_v15 }
 0x2a8   :  { %2605 = vmatprep.subr.bf16.mxu0 %v3588_v21 }
 0x2ab   :  { %2606 = vmatpush3.bf16.msra.mxu0 %v3598_v44  ;;  %v3678_v44 = vshrl.u32 %v64_v16, 7 }
 0x2ad   :  { %v1181_v46 = vsub.s32 4, %v3678_v44  ;;  %v1113_v33 = vsub.s32 0, %v3678_v44  ;;  %v1147_v48 = vsub.s32 2, %v3678_v44  ;;  %v1188_v50 = vsub.s32 5, %v3678_v44 }
 0x2ae   :  { %1053 = vmatmul.mubr.bf16.vlgmr.msra.gmra.mrb[12].mxu0 %v1014_v8  ;;  %v1222_v32 = vsub.s32 7, %v3678_v44  ;;  %v1130_v57 = vsub.s32 1, %v3678_v44  ;;  %v1164_v61 = vsub.s32 3, %v3678_v44  ;;  %v1205_v35 = vsub.s32 6, %v3678_v44 }
 0x2af   :  { %v1182_v42 = vrot.slane %v1102_v41, %v1181_v46  ;;  %v1114_v16 = vrot.slane %v1102_v41, %v1113_v33  ;;  %v1148_v49 = vrot.slane %v1102_v41, %v1147_v48  ;;  %v1189_v51 = vrot.slane %v1102_v41, %v1188_v50  ;;  %v2988_v48 = vld [vmem:[%s4012_s7 + $0x40] sm:$0xff]  }
 0x2b0   :  { %v1223_v55 = vrot.slane %v1102_v41, %v1222_v32  ;;  %v1131_v60 = vrot.slane %v1102_v41, %v1130_v57  ;;  %v1165_v62 = vrot.slane %v1102_v41, %v1164_v61  ;;  %v1206_v0 = vrot.slane %v1102_v41, %v1205_v35  ;;  %v2991_v50 = vld [vmem:[%s4012_s7 + $0x80] sm:$0xff]   ;;  %2626 = vmatprep.subr.bf16.mxu0 %v2988_v48  ;;  %v2992_v35 = vld [vmem:[%s4012_s7 + $0x48] sm:$0xff]  }
 0x2b1   :  { %v3009_v48 = vld [vmem:[%s4012_s7 + $0x28] sm:$0xff]  }
 0x361   :  { %v1006_v1 = vpop.f32.mrb[8].mxu0 }
 0x362   :  { %v2579_v2 = vpop.f32.mrb[4].mxu1  ;;  %v2729_v3 = vpop.f32.mrb[9].mxu0 }
 0x363   :  { %v2580_v4 = vpop.f32.mrb[5].mxu1  ;;  %v1009_v7 = vpop.f32.mrb[10].mxu0 }
 0x364   :  { %v2581_v9 = vadd.f32 %v2580_v4, %v2579_v2  ;;  %v2582_v5 = vpop.f32.mrb[6].mxu1  ;;  %v2730_v25 = vpop.f32.mrb[11].mxu0 }
 0x365   :  { %v2583_v17 = vpop.f32.mrb[7].mxu1  ;;  %v1268_v25 = vld [vmem:[%s4011_s6 + $0x8] sm:$0xff] }
 0x366   :  { %v1007_v11 = vadd.f32 %v2581_v9, %v1006_v1  ;;  %v2986_v17 = vld [vmem:[%s4010_s5] sm:$0xff]  }
 0x367   :  { %2755 = vmatprep.mubr.msk.bf16.mxu1 %vm1328_vm14, %v2986_v17  ;;  %v3002_v17 = vld [vmem:[%s4012_s7 + $0xd8] sm:$0xff]  }
 0x368   :  { %1013 = vst.msk [vmem:[#allocation3] sm:$0xf] %vm1012_vm12, %v1007_v11  ;;  %v1270_v11 = vld [vmem:[%s4011_s6 + $0x18] sm:$0xff] }
 0x376   :  { %v1094_v28 = vpop.f32.mrb[8].mxu1 }
 0x377   :  { %v2743_v15 = vpop.f32.mrb[9].mxu1 }
 0x378   :  { %v1097_v31 = vpop.f32.mrb[10].mxu1  ;;  %v1269_v15 = vld [vmem:[%s4011_s6 + $0x10] sm:$0xff] }
 0x379   :  { %v2744_v21 = vpop.f32.mrb[11].mxu1 }
 0x381   :  { %v2607_v23 = vpop.f32.mrb[12].mxu0 }
 0x382   :  { %v2608_v30 = vpop.f32.mrb[13].mxu0 }
 0x383   :  { %v2609_v39 = vadd.f32 %v2608_v30, %v2607_v23  ;;  %v2610_v26 = vpop.f32.mrb[14].mxu0 }
 0x384   :  { %v2611_v40 = vpop.f32.mrb[15].mxu0 }
 0x385   :  { %v1095_v14 = vadd.f32 %v2609_v39, %v1094_v28  ;;  %v1267_v28 = vld [vmem:[%s4011_s6] sm:$0xff] }
 0x387   :  { %1100 = vst.msk [vmem:[#allocation3 + $0x4] sm:$0xf] %vm1012_vm12, %v1095_v14 }
 0x38e   :  { %v1101_v43 = vld [vmem:[#allocation3] sm:$0xff] }
 0x38f   :  { %1105 = vrot.lane.b32.xlu1 %v1101_v43, %s3090_s17  ;;  %v1183_v34 = vmul.f32 %v1182_v42, %v1101_v43 }
 0x391   :  { %v1184_v36 = vpack.c.bf16 %v1183_v34, %v1183_v34 }
 0x393   :  { %1185 = vst.msk [vmem:[#allocation4 + $0x10] sm:$0xf] %vm1012_vm12, %v1184_v36  ;;  %1116 = vrot.lane.b32.xlu1 %v1114_v16, %s3091_s18  ;;  %v2987_v16 = vld [vmem:[%s4010_s5 + $0x8] sm:$0xff]   ;;  %v2989_v36 = vld [vmem:[%s4012_s7] sm:$0xff]  }
 0x394   :  { %2627 = vmatpush3.bf16.msra.mxu0 %v2989_v36  ;;  %v3010_v36 = vld [vmem:[%s4012_s7 + $0xe8] sm:$0xff]  }
 0x395   :  { %2628 = vmatprep.subr.bf16.mxu0 %v2992_v35  ;;  %v3018_v35 = vld [vmem:[%s4012_s7 + $0xf8] sm:$0xff]  }
 0x397   :  { %1150 = vrot.lane.b32.xlu1 %v1148_v49, %s3092_s19  ;;  %v2990_v49 = vld [vmem:[%s4012_s7 + $0xc0] sm:$0xff]  }
 0x39b   :  { %1191 = vrot.lane.b32.xlu1 %v1189_v51, %s3079_s23  ;;  %s3095_s23 = smov 63  }
 0x39f   :  { %1225 = vrot.lane.b32.xlu1 %v1223_v55, %s3093_s20  ;;  %v3105_v55 = vmov 1966171168  }
 0x3a0   :  { %v1398_v57 = vunpack.c.l.s4 %v3105_v55 }
 0x401   :  { %v1106_v18 = vpop.permute.xlu1 %1105 }
 0x402   :  { %v1107_v19 = vsel %vm1104_vm13, %v1106_v18, %v1101_v43 }
 0x403   :  { %1108 = vrot.lane.b32.xlu0 %v1107_v19, %s3090_s17 }
 0x405   :  { %v1117_v45 = vpop.permute.xlu1 %1116 }
 0x407   :  { %1133 = vrot.lane.b32.xlu0 %v1131_v60, %s3094_s21  ;;  %v1399_v60 = vunpack.c.0.s8 %v1398_v57  ;;  %v3014_v57 = vld [vmem:[%s4012_s7 + $0xf0] sm:$0xff]  }
 0x409   :  { %v1151_v47 = vpop.permute.xlu1 %1150 }
 0x40b   :  { %1167 = vrot.lane.b32.xlu0 %v1165_v62, %s3095_s23 }
 0x40d   :  { %v1192_v54 = vpop.permute.xlu1 %1191 }
 0x40f   :  { %1208 = vrot.lane.b32.xlu0 %v1206_v0, %s3096_s22 }
 0x411   :  { %v1226_v59 = vpop.permute.xlu1 %1225 }
 0x413   :  { %1242 = vrot.lane.b32.xlu0 %v2446_v37, %s3097_s26 }
 0x475   :  { %v1109_v22 = vpop.permute.xlu0 %1108 }
 0x476   :  { %v1110_v52 = vsel %vm1104_vm13, %v1109_v22, %v1101_v43 }
 0x477   :  { %v1119_v38 = vmul.f32 %v1117_v45, %v1110_v52  ;;  %v1153_v63 = vmul.f32 %v1151_v47, %v1110_v52  ;;  %v1194_v58 = vmul.f32 %v1192_v54, %v1110_v52  ;;  %v1228_v6 = vmul.f32 %v1226_v59, %v1110_v52  ;;  %v2993_v47 = vld [vmem:[%s4012_s7 + $0x8] sm:$0xff]  }
 0x478   :  { %2629 = vmatpush3.bf16.msra.mxu0 %v2993_v47  ;;  %v3020_v47 = vld [vmem:[%s4012_s7 + $0x140] sm:$0xff]  }
 0x479   :  { %v1134_v53 = vpop.permute.xlu0 %1133  ;;  %v2555_v27 = vpack.c.bf16 %v1119_v38, %v1119_v38  ;;  %v2557_v29 = vpack.c.bf16 %v1153_v63, %v1153_v63  ;;  %v2559_v1 = vpack.c.bf16 %v1194_v58, %v1194_v58  ;;  %v2561_v4 = vpack.c.bf16 %v1228_v6, %v1228_v6  ;;  %v2994_v38 = vld [vmem:[%s4012_s7 + $0xc8] sm:$0xff]   ;;  %v2997_v58 = vld [vmem:[%s4012_s7 + $0x10] sm:$0xff]  }
 0x47a   :  { %v1136_v10 = vmul.f32 %v1134_v53, %v1110_v52  ;;  %v2995_v53 = vld [vmem:[%s4012_s7 + $0x88] sm:$0xff]  }
 0x47b   :  { %1124 = vrot.lane.b32.xlu1 %v2555_v27, %s3098_s28  ;;  %v3755_v27 = vsub.s32 %v1399_v60, %v3678_v44  ;;  %v2998_v44 = vld [vmem:[%s4012_s7 + $0xd0] sm:$0xff]   ;;  %s3106_s28 = smov [#allocation6]  }
 0x47c   :  { %v2556_v12 = vpack.c.bf16 %v1136_v10, %v1136_v10  ;;  %v3015_v60 = vld [vmem:[%s4012_s7 + $0xb0] sm:$0xff]  }
 0x47d   :  { %v1168_v13 = vpop.permute.xlu0 %1167 }
 0x47e   :  { %v1170_v56 = vmul.f32 %v1168_v13, %v1110_v52  ;;  %1141 = vrot.lane.b32.xlu0 %v2556_v12, %s3099_s4  ;;  %v2996_v12 = vld [vmem:[%s4012_s7 + $0x50] sm:$0xff]   ;;  %s2357_s4 = sshll.u32 %s3106_s28, 4  ;;  %s2358_s4 = int_to_ptr.vmem [resolvable:$true] %s2357_s4 }
 0x47f   :  { %1158 = vrot.lane.b32.xlu1 %v2557_v29, %s3100_s29  ;;  %2630 = vmatprep.subr.bf16.mxu0 %v2996_v12  ;;  %s3055_s29 = scalar_lea.vmem %s2358_s4, 32  ;;  %p3060_p1 = scmp.lt.s32.totalorder %s2358_s4, %s2358_s4 }
 0x480   :  { %v2558_v20 = vpack.c.bf16 %v1170_v56, %v1170_v56  ;;  %2631 = vmatpush3.bf16.msra.mxu0 %v2997_v58  ;;  %p3056_p0 = scmp.ne.s32.totalorder %s2358_s4, %s3055_s29  ;;  %p3061_p2 = scmp.lt.s32.totalorder %s3055_s29, %s3055_s29 }
 0x481   :  { %v1209_v8 = vpop.permute.xlu0 %1208 }
 0x482   :  { %v1211_v2 = vmul.f32 %v1209_v8, %v1110_v52  ;;  %1175 = vrot.lane.b32.xlu0 %v2558_v20, %s3101_s30  ;;  %v2999_v8 = vld [vmem:[%s4012_s7 + $0x90] sm:$0xff]   ;;  %p3062_p3 = por %p3061_p2, %p3060_p1 }
 0x483   :  { %1199 = vrot.lane.b32.xlu1 %v2559_v1, %s3083_s0 }
 0x484   :  { %v2560_v3 = vpack.c.bf16 %v1211_v2, %v1211_v2  ;;  %p3063_p4 = pnand %p3062_p3, %p3056_p0 }
 0x485   :  { %v1243_v7 = vpop.permute.xlu0 %1242 }
 0x486   :  { %v1245_v9 = vmul.f32 %v1243_v7, %v1110_v52  ;;  %1216 = vrot.lane.b32.xlu0 %v2560_v3, %s3102_s12  ;;  %v3000_v3 = vld [vmem:[%s4012_s7 + $0x58] sm:$0xff]  }
 0x487   :  { %1233 = vrot.lane.b32.xlu1 %v2561_v4, %s3103_s2  ;;  %2632 = vmatprep.subr.bf16.mxu0 %v3000_v3 }
 0x488   :  { %v2562_v5 = vpack.c.bf16 %v1245_v9, %v1245_v9  ;;  %v3001_v9 = vld [vmem:[%s4012_s7 + $0x18] sm:$0xff]  }
 0x489   :  { %2633 = vmatpush3.bf16.msra.mxu0 %v3001_v9 }
 0x48a   :  { %1250 = vrot.lane.b32.xlu0 %v2562_v5, %s3104_s13 }
 0x48b   :  { %1273 = vperm.xlu1 %2932, %v1267_v28  }
 0x48e   :  { %1278 = vperm.xlu0 %2906, %v1268_v25  }
 0x48f   :  { %1283 = vperm.xlu1 %2932, %v1269_v15  }
 0x492   :  { %1288 = vperm.xlu0 %2906, %v1270_v11  }
 0x4ed   :  { %v1125_v31 = vpop.permute.xlu1 %1124 }
 0x4ee   :  { %1127 = vst.msk [vmem:[#allocation4] sm:$0xf] %vm1012_vm12, %v1125_v31 }
 0x4f0   :  { %v1142_v21 = vpop.permute.xlu0 %1141 }
 0x4f1   :  { %1144 = vst.msk [vmem:[#allocation4 + $0x4] sm:$0xf] %vm1012_vm12, %v1142_v21  ;;  %v1159_v23 = vpop.permute.xlu1 %1158  ;;  %v3003_v21 = vld [vmem:[%s4012_s7 + $0x98] sm:$0xff]  }
 0x4f2   :  { %1161 = vst.msk [vmem:[#allocation4 + $0x8] sm:$0xf] %vm1012_vm12, %v1159_v23 }
 0x4f4   :  { %v1176_v30 = vpop.permute.xlu0 %1175 }
 0x4f5   :  { %1178 = vst.msk [vmem:[#allocation4 + $0xc] sm:$0xf] %vm1012_vm12, %v1176_v30  ;;  %v1200_v39 = vpop.permute.xlu1 %1199 }
 0x4f6   :  { %1202 = vst.msk [vmem:[#allocation4 + $0x14] sm:$0xf] %vm1012_vm12, %v1200_v39  ;;  %v3004_v39 = vld [vmem:[%s4012_s7 + $0x60] sm:$0xff]  }
 0x4f7   :  { %2634 = vmatprep.subr.bf16.mxu0 %v3004_v39  ;;  %v3034_v39 = vld [vmem:[%s4012_s7 + $0x118] sm:$0xff]  }
 0x4f8   :  { %v1217_v26 = vpop.permute.xlu0 %1216  ;;  %v2981_v40 = vld [vmem:[#allocation4] sm:$0xff]  }
 0x4f9   :  { %1219 = vst.msk [vmem:[#allocation4 + $0x18] sm:$0xf] %vm1012_vm12, %v1217_v26  ;;  %v1234_v14 = vpop.permute.xlu1 %1233  ;;  %2745 = vmatprep.subr.bf16.mxu1 %v2981_v40 }
 0x4fa   :  { %1236 = vst.msk [vmem:[#allocation4 + $0x1c] sm:$0xf] %vm1012_vm12, %v1234_v14  ;;  %2746 = vmatpush3.bf16.msra.mxu1 %v2981_v40 }
 0x4fc   :  { %v1251_v46 = vpop.permute.xlu0 %1250  ;;  %v2982_v41 = vld [vmem:[#allocation4 + $0x8] sm:$0xff]  }
 0x4fd   :  { %1253 = vst.msk [vmem:[#allocation4 + $0x20] sm:$0xf] %vm1012_vm12, %v1251_v46  ;;  %v2983_v42 = vld [vmem:[#allocation4 + $0x10] sm:$0xff]   ;;  %2747 = vmatprep.subr.bf16.mxu1 %v2982_v41  ;;  %v3005_v46 = vld [vmem:[%s4012_s7 + $0x20] sm:$0xff]  }
 0x4fe   :  { %2748 = vmatpush3.bf16.msra.mxu1 %v2982_v41  ;;  %2635 = vmatpush3.bf16.msra.mxu0 %v3005_v46  ;;  %v3038_v46 = vld [vmem:[%s4012_s7 + $0x120] sm:$0xff]  }
 0x4ff   :  { %2749 = vmatprep.subr.bf16.mxu1 %v2983_v42 }
 0x501   :  { %v2984_v33 = vld [vmem:[#allocation4 + $0x18] sm:$0xff]  }
 0x502   :  { %2750 = vmatpush3.bf16.msra.mxu1 %v2983_v42 }
 0x503   :  { %2751 = vmatprep.subr.bf16.mxu1 %v2984_v33 }
 0x504   :  { %v2985_v43 = vld [vmem:[#allocation4 + $0x20] ss:$0 sps:$4 sm:$0xff]  }
 0x505   :  { %v1337_v34 = vsel %vm1335_vm15, %v2985_v43, 0 }
 0x506   :  { %2752 = vmatpush3.bf16.msra.mxu1 %v2984_v33 }
 0x507   :  { %2767 = vmatprep.subr.msk.bf16.mxu1 %vm1335_vm15, %v2985_v43  ;;  %v3006_v43 = vld [vmem:[%s4012_s7 + $0xe0] sm:$0xff]  }
 0x50a   :  { %2754 = vmatpush3.bf16.msra.mxu1 %v1337_v34  ;;  %v1274_v51 = vpop.permute.xlu1 %1273  ;;  %v3007_v34 = vld [vmem:[%s4012_s7 + $0xa0] sm:$0xff]  }
 0x50b   :  { %2648 = vmatprep.subr.bf16.mxu1 %v2990_v49  ;;  %v3012_v49 = vld [vmem:[%s4012_s7 + $0x70] sm:$0xff]  }
 0x50d   :  { %2756 = vmatmul.mubr.msk.bf16.vlgmr.msra.gmra.mrb[12].mxu1 %vm1328_vm14, %v2987_v16  ;;  %v1279_v32 = vpop.permute.xlu0 %1278  ;;  %v3008_v16 = vld [vmem:[%s4012_s7 + $0x68] sm:$0xff]  }
 0x50e   :  { %2649 = vmatpush3.bf16.msra.mxu1 %v2991_v50  ;;  %v1284_v18 = vpop.permute.xlu1 %1283  ;;  %2636 = vmatprep.subr.bf16.mxu0 %v3008_v16  ;;  %v3011_v50 = vld [vmem:[%s4012_s7 + $0xa8] sm:$0xff]  }
 0x50f   :  { %2650 = vmatprep.subr.bf16.mxu1 %v2994_v38  ;;  %2637 = vmatpush3.bf16.msra.mxu0 %v3009_v48  ;;  %v3044_v16 = vld [vmem:[%s4012_s7 + $0x1a8] sm:$0xff]   ;;  %v3047_v48 = vld [vmem:[%s4012_s7 + $0x1f0] sm:$0xff]  }
 0x510   :  { %2638 = vmatprep.subr.bf16.mxu0 %v3012_v49  ;;  %v3049_v49 = vld [vmem:[%s4012_s7 + $0x178] sm:$0xff]  }
 0x511   :  { %v1289_v0 = vpop.permute.xlu0 %1288 }
 0x512   :  { %2651 = vmatpush3.bf16.msra.mxu1 %v2995_v53 }
 0x513   :  { %2652 = vmatprep.subr.bf16.mxu1 %v2998_v44 }
 0x516   :  { %2653 = vmatpush3.bf16.msra.mxu1 %v2999_v8  ;;  %v3021_v8 = vld [vmem:[%s4012_s7 + $0x100] sm:$0xff]  }
 0x517   :  { %2654 = vmatprep.subr.bf16.mxu1 %v3002_v17  ;;  %v3026_v17 = vld [vmem:[%s4012_s7 + $0x108] sm:$0xff]  }
 0x51a   :  { %2655 = vmatpush3.bf16.msra.mxu1 %v3003_v21  ;;  %v3033_v21 = vld [vmem:[%s4012_s7 + $0x158] sm:$0xff]  }
 0x51b   :  { %2656 = vmatprep.subr.bf16.mxu1 %v3006_v43  ;;  %v3042_v43 = vld [vmem:[%s4012_s7 + $0x128] sm:$0xff]  }
 0x51e   :  { %2657 = vmatpush3.bf16.msra.mxu1 %v3007_v34  ;;  %v3045_v34 = vld [vmem:[%s4012_s7 + $0x170] sm:$0xff]  }
 0x51f   :  { %2658 = vmatprep.subr.bf16.mxu1 %v3010_v36  ;;  %v3046_v36 = vld [vmem:[%s4012_s7 + $0x130] sm:$0xff]  }
 0x522   :  { %2659 = vmatpush3.bf16.msra.mxu1 %v3011_v50  ;;  %v3048_v50 = vld [vmem:[%s4012_s7 + $0x1b0] sm:$0xff]  }
 0x523   :  { %2660 = vmatprep.subr.bf16.mxu1 %v3014_v57 }
 0x526   :  { %2661 = vmatpush3.bf16.msra.mxu1 %v3015_v60 }
 0x527   :  { %2662 = vmatprep.subr.bf16.mxu1 %v3018_v35 }
 0x5e0   :  { %v2757_v19 = vpop.f32.mrb[12].mxu1 }
 0x5e1   :  { %v1382_v61 = vadd.f32 %v2757_v19, %v1284_v18  ;;  %v1373_v62 = vpop.f32.mrb[13].mxu1  ;;  %v3013_v18 = vld [vmem:[%s4012_s7 + $0x30] sm:$0xff]   ;;  %v3016_v19 = vld [vmem:[%s4012_s7 + $0x78] sm:$0xff]  }
 0x5e2   :  { %v1374_v37 = vadd.f32 %v1373_v62, %v1274_v51  ;;  %v2758_v45 = vpop.f32.mrb[14].mxu1  ;;  %2639 = vmatpush3.bf16.msra.mxu0 %v3013_v18 }
 0x5e3   :  { %v1385_v22 = vadd.f32 %v2758_v45, %v1289_v0  ;;  %v1376_v52 = vpop.f32.mrb[15].mxu1  ;;  %v1390_v63 = vmax.f32 %v1382_v61, 0.0  ;;  %v3017_v0 = vld [vmem:[%s4012_s7 + $0x38] sm:$0xff]   ;;  %2640 = vmatprep.subr.bf16.mxu0 %v3016_v19  ;;  %v3053_v19 = vld [vmem:[%s4014_s9] sm:$0xff]  }
 0x5e4   :  { %v1377_v54 = vadd.f32 %v1376_v52, %v1279_v32  ;;  %v1388_v13 = vmax.f32 %v1374_v37, 0.0  ;;  %v3019_v37 = vld [vmem:[%s4012_s7 + $0xb8] sm:$0xff]  }
 0x5e5   :  { %v1391_v10 = vmax.f32 %v1385_v22, 0.0  ;;  %2663 = vmatpush3.bf16.msra.mxu1 %v3019_v37  ;;  %v3023_v22 = vld [vmem:[%s4012_s7 + $0x1c0] sm:$0xff]  }
 0x5e6   :  { %v1389_v29 = vmax.f32 %v1377_v54, 0.0  ;;  %2641 = vmatpush3.bf16.msra.mxu0 %v3017_v0  ;;  %2692 = vmatprep.subr.bf16.mxu1 %v3023_v22 }
 0x5e7   :  { %v1393_v59 = vpack.c.bf16 %v1391_v10, %v1390_v63  ;;  %v2458_v56 = vpack.c.bf16 %v1391_v10, %v1391_v10  ;;  %2670 = vmatprep.subr.bf16.mxu0 %v3020_v47 }
 0x5e8   :  { %v1392_v20 = vpack.c.bf16 %v1389_v29, %v1388_v13  ;;  %v2457_v6 = vpack.c.bf16 %v1389_v29, %v1389_v29 }
 0x5e9   :  { %v1477_v1 = vrot.slane %v1393_v59, %v3755_v27  ;;  %v3771_v2 = vrot.slane %v2458_v56, %v3755_v27  ;;  %1469 = vst.msk [vmem:[#allocation5 + $0x4] sm:$0x1] %vm1394_vm0, %v1393_v59 }
 0x5ea   :  { %v1403_v4 = vrot.slane %v1392_v20, %v3755_v27  ;;  %v1439_v7 = vrot.slane %v2457_v6, %v3755_v27  ;;  %1395 = vst.msk [vmem:[#allocation5] sm:$0x1] %vm1394_vm0, %v1392_v20 }
 0x5eb   :  { %v1478_v5 = vcombine.high %v1477_v1, %v1477_v1  ;;  %v1485_v25 = vrot.slane %v1477_v1, %v3755_v27  ;;  %v1519_v11 = vrot.slane %v3771_v2, %v3755_v27  ;;  %v1522_v55 = vcombine.high %v3771_v2, %v3771_v2 }
 0x5ec   :  { %v1404_v28 = vcombine.high %v1403_v4, %v1403_v4  ;;  %v1411_v15 = vrot.slane %v1403_v4, %v3755_v27  ;;  %v1446_v31 = vrot.slane %v1439_v7, %v3755_v27  ;;  %v1449_v33 = vcombine.high %v1439_v7, %v1439_v7  ;;  %v3024_v4 = vld [vmem:[%s4012_s7 + $0x180] sm:$0xff]   ;;  %v3025_v7 = vld [vmem:[%s4012_s7 + $0x148] sm:$0xff]  }
 0x5ed   :  { %v1492_v23 = vrot.slane %v1478_v5, %v3755_v27  ;;  %v1497_v30 = vcombine.high %v1485_v25, %v1485_v25  ;;  %1521 = vst.msk [vmem:[#allocation5 + $0x6] sm:$0x1] %vm1394_vm0, %v1519_v11  ;;  %v1534_v26 = vcombine.high %v1519_v11, %v1519_v11  ;;  %v1529_v62 = vrot.slane %v1522_v55, %v3755_v27  ;;  %v3027_v5 = vld [vmem:[%s4012_s7 + $0x1c8] sm:$0xff]   ;;  %v3029_v11 = vld [vmem:[%s4012_s7 + $0x150] sm:$0xff]   ;;  %v3052_v55 = vld [vmem:[%s4012_s7 + $0x1b8] sm:$0xff]  }
 0x5ee   :  { %v1424_v40 = vcombine.high %v1411_v15, %v1411_v15  ;;  %1448 = vst.msk [vmem:[#allocation5 + $0x2] sm:$0x1] %vm1394_vm0, %v1446_v31  ;;  %v1461_v14 = vcombine.high %v1446_v31, %v1446_v31  ;;  %v1418_v42 = vrot.slane %v1404_v28, %v3755_v27  ;;  %v1456_v32 = vrot.slane %v1449_v33, %v3755_v27  ;;  %v3028_v28 = vld [vmem:[%s4012_s7 + $0x188] sm:$0xff]   ;;  %v3031_v15 = vld [vmem:[%s4012_s7 + $0x1d0] sm:$0xff]  }
 0x5ef   :  { %1493 = vrot.lane.b32.xlu1 %v1492_v23, %s3090_s17  ;;  %v1500_v41 = vcombine.high %v1492_v23, %v1492_v23  ;;  %1499 = vst.msk [vmem:[#allocation5 + $0x5] sm:$0x1] %vm1394_vm0, %v1497_v30  ;;  %1536 = vst.msk [vmem:[#allocation5 + $0x7] sm:$0x1] %vm1394_vm0, %v1534_v26  ;;  %v1537_v45 = vcombine.high %v1529_v62, %v1529_v62  ;;  %v3030_v31 = vld [vmem:[%s4012_s7 + $0x110] sm:$0xff]   ;;  %v3035_v30 = vld [vmem:[%s4012_s7 + $0x1d8] sm:$0xff]  }
 0x5f0   :  { %1426 = vst.msk [vmem:[#allocation5 + $0x1] sm:$0x1] %vm1394_vm0, %v1424_v40  ;;  %1463 = vst.msk [vmem:[#allocation5 + $0x3] sm:$0x1] %vm1394_vm0, %v1461_v14  ;;  %v1427_v51 = vcombine.high %v1418_v42, %v1418_v42  ;;  %v1464_v61 = vcombine.high %v1456_v32, %v1456_v32  ;;  %v3032_v23 = vld [vmem:[%s4012_s7 + $0x190] sm:$0xff]   ;;  %v3037_v26 = vld [vmem:[%s4012_s7 + $0x160] sm:$0xff]  }
 0x5f1   :  { %1501 = vrot.lane.b32.xlu0 %v1500_v41, %s3090_s17  ;;  %v3036_v40 = vld [vmem:[%s4012_s7 + $0x198] sm:$0xff]   ;;  %v3039_v14 = vld [vmem:[%s4012_s7 + $0x1e0] sm:$0xff]   ;;  %v3041_v41 = vld [vmem:[%s4012_s7 + $0x168] sm:$0xff]  }
 0x5f2   :  { %v3043_v33 = vld [vmem:[%s4012_s7 + $0x1e8] sm:$0xff]  }
 0x5f3   :  { %1419 = vrot.lane.b32.xlu1 %v1418_v42, %s3090_s17  ;;  %v3040_v42 = vld [vmem:[%s4012_s7 + $0x1a0] sm:$0xff]  }
 0x5f5   :  { %1428 = vrot.lane.b32.xlu0 %v1427_v51, %s3090_s17  ;;  %v3051_v51 = vld [vmem:[%s4012_s7 + $0x1f8] sm:$0xff]  }
 0x5f7   :  { %1457 = vrot.lane.b32.xlu1 %v1456_v32, %s3090_s17  ;;  %v3050_v32 = vld [vmem:[%s4012_s7 + $0x138] sm:$0xff]  }
 0x5f9   :  { %1465 = vrot.lane.b32.xlu0 %v1464_v61, %s3090_s17  ;;  %v2459_v61 = vld [vmem:[%s4013_s8] ss:$0 sm:$0xff] }
 0x5fb   :  { %1530 = vrot.lane.b32.xlu1 %v1529_v62, %s3090_s17 }
 0x5fd   :  { %1538 = vrot.lane.b32.xlu0 %v1537_v45, %s3090_s17 }
 0x661   :  { %v1494_v52 = vpop.permute.xlu1 %1493 }
 0x662   :  { %1496 = vst.msk [vmem:[#allocation5 + $0x4] sm:$0x1] %vm1422_vm1, %v1494_v52 }
 0x663   :  { %v1502_v38 = vpop.permute.xlu0 %1501 }
 0x664   :  { %1504 = vst.msk [vmem:[#allocation5 + $0x5] sm:$0x1] %vm1422_vm1, %v1502_v38 }
 0x665   :  { %v1420_v54 = vpop.permute.xlu1 %1419 }
 0x666   :  { %1423 = vst.msk [vmem:[#allocation5] sm:$0x1] %vm1422_vm1, %v1420_v54 }
 0x667   :  { %v1429_v53 = vpop.permute.xlu0 %1428 }
 0x668   :  { %1431 = vst.msk [vmem:[#allocation5 + $0x1] sm:$0x1] %vm1422_vm1, %v1429_v53 }
 0x669   :  { %v1458_v63 = vpop.permute.xlu1 %1457 }
 0x66a   :  { %1460 = vst.msk [vmem:[#allocation5 + $0x2] sm:$0x1] %vm1422_vm1, %v1458_v63 }
 0x66b   :  { %v1466_v10 = vpop.permute.xlu0 %1465 }
 0x66c   :  { %1468 = vst.msk [vmem:[#allocation5 + $0x3] sm:$0x1] %vm1422_vm1, %v1466_v10 }
 0x66d   :  { %v1531_v12 = vpop.permute.xlu1 %1530 }
 0x66e   :  { %1533 = vst.msk [vmem:[#allocation5 + $0x6] sm:$0x1] %vm1422_vm1, %v1531_v12 }
 0x66f   :  { %v1539_v13 = vpop.permute.xlu0 %1538 }
 0x670   :  { %1541 = vst.msk [vmem:[#allocation5 + $0x7] sm:$0x1] %vm1422_vm1, %v1539_v13 }
 0x677   :  { %v1542_v29 = vld [vmem:[#allocation5] sm:$0xff] }
 0x678   :  { %v1686_v58 = vrot.slane %v1542_v29, %v3755_v27  ;;  %v1679_v59 = vcombine.high %v1542_v29, %v1542_v29 }
 0x67a   :  { %v1694_v56 = vcombine.high %v1686_v58, %v1686_v58  ;;  %v3878_v44 = vrot.slane %v1679_v59, %v3755_v27  ;;  %v1702_v20 = vrot.slane %v1686_v58, %v3755_v27 }
 0x67c   :  { %v1716_v6 = vrot.slane %v1694_v56, %v3755_v27  ;;  %v1695_v1 = vcombine.high %v3878_v44, %v3878_v44  ;;  %v1724_v9 = vcombine.high %v1702_v20, %v1702_v20  ;;  %v1709_v57 = vrot.slane %v3878_v44, %v3755_v27 }
 0x67e   :  { %2152 = vmatprep.mubr.bf16.mxu0 %v1716_v6  ;;  %v1726_v2 = vcombine.high %v1716_v6, %v1716_v6  ;;  %v1723_v3 = vrot.slane %v1695_v1, %v3755_v27  ;;  %v1725_v18 = vcombine.high %v1709_v57, %v1709_v57  ;;  %v3054_v27 = vld [vmem:[%s4014_s9 + $0x8] sm:$0xff]  }
 0x67f   :  { %2153 = vmatmul.mubr.bf16.vlgmr.msra.gmra.mrb[16].mxu0 %v1702_v20 }
 0x680   :  { %2671 = vmatpush3.bf16.msra.mxu0 %v3021_v8  ;;  %2192 = vmatprep.mubr.bf16.mxu1 %v1726_v2  ;;  %v1727_v25 = vcombine.high %v1723_v3, %v1723_v3  ;;  %v2524_v2 = vld [vmem:[%s4015_s10] ss:$0 sm:$0xff] }
 0x681   :  { %2232 = vmatprep.mubr.bf16.mxu0 %v1723_v3  ;;  %2193 = vmatmul.mubr.bf16.vlgmr.msra.gmra.mrb[16].mxu1 %v1724_v9 }
 0x682   :  { %2693 = vmatpush3.bf16.msra.mxu1 %v3024_v4  ;;  %2672 = vmatprep.subr.bf16.mxu0 %v3025_v7 }
 0x683   :  { %2272 = vmatprep.mubr.bf16.mxu1 %v1727_v25  ;;  %2694 = vmatprep.subr.bf16.mxu1 %v3027_v5 }
 0x684   :  { %2673 = vmatpush3.bf16.msra.mxu0 %v3026_v17 }
 0x685   :  { %2674 = vmatprep.subr.bf16.mxu0 %v3029_v11 }
 0x686   :  { %2695 = vmatpush3.bf16.msra.mxu1 %v3028_v28 }
 0x687   :  { %2696 = vmatprep.subr.bf16.mxu1 %v3031_v15 }
 0x688   :  { %2675 = vmatpush3.bf16.msra.mxu0 %v3030_v31 }
 0x689   :  { %2676 = vmatprep.subr.bf16.mxu0 %v3033_v21 }
 0x68a   :  { %2697 = vmatpush3.bf16.msra.mxu1 %v3032_v23 }
 0x68b   :  { %2698 = vmatprep.subr.bf16.mxu1 %v3035_v30 }
 0x68c   :  { %2677 = vmatpush3.bf16.msra.mxu0 %v3034_v39 }
 0x68d   :  { %2678 = vmatprep.subr.bf16.mxu0 %v3037_v26 }
 0x68e   :  { %2699 = vmatpush3.bf16.msra.mxu1 %v3036_v40 }
 0x68f   :  { %2700 = vmatprep.subr.bf16.mxu1 %v3039_v14 }
 0x690   :  { %2679 = vmatpush3.bf16.msra.mxu0 %v3038_v46 }
 0x691   :  { %2680 = vmatprep.subr.bf16.mxu0 %v3041_v41 }
 0x692   :  { %2701 = vmatpush3.bf16.msra.mxu1 %v3040_v42 }
 0x693   :  { %2702 = vmatprep.subr.bf16.mxu1 %v3043_v33 }
 0x694   :  { %2681 = vmatpush3.bf16.msra.mxu0 %v3042_v43 }
 0x695   :  { %2682 = vmatprep.subr.bf16.mxu0 %v3045_v34 }
 0x696   :  { %2703 = vmatpush3.bf16.msra.mxu1 %v3044_v16 }
 0x697   :  { %2704 = vmatprep.subr.bf16.mxu1 %v3047_v48 }
 0x698   :  { %2683 = vmatpush3.bf16.msra.mxu0 %v3046_v36 }
 0x699   :  { %2684 = vmatprep.subr.bf16.mxu0 %v3049_v49 }
 0x69a   :  { %2705 = vmatpush3.bf16.msra.mxu1 %v3048_v50 }
 0x69b   :  { %2706 = vmatprep.subr.bf16.mxu1 %v3051_v51 }
 0x69c   :  { %2685 = vmatpush3.bf16.msra.mxu0 %v3050_v32 }
 0x69d   :  { %2759 = vmatprep.subr.bf16.mxu0 %v3088_v24 }
 0x69e   :  { %2707 = vmatpush3.bf16.msra.mxu1 %v3052_v55 }
 0x69f   :  { %2233 = vmatmul.mubr.bf16.vlgmr.msra.gmra.mrb[20].mxu0 %v1709_v57 }
 0x6a0   :  { %2763 = vmatprep.mubr.msk.bf16.mxu0 %vm3089_vm10, %v3088_v24  ;;  %2760 = vmatpush3.bf16.msra.mxu0 %v3053_v19 }
 0x6a1   :  { %2273 = vmatmul.mubr.bf16.vlgmr.msra.gmra.mrb[20].mxu1 %v1725_v18  ;;  %2761 = vmatprep.subr.bf16.mxu0 %v3088_v24 }
 0x6a4   :  { %2762 = vmatpush3.bf16.msra.mxu0 %v3054_v27 }
 0x752   :  { %v2642_v60 = vpop.f32.mrb[16].mxu0 }
 0x753   :  { %v2643_v62 = vpop.f32.mrb[17].mxu0 }
 0x754   :  { %v2644_v35 = vadd.f32 %v2643_v62, %v2642_v60  ;;  %v2645_v0 = vpop.f32.mrb[18].mxu0  ;;  %v2664_v37 = vpop.f32.mrb[16].mxu1 }
 0x755   :  { %v2646_v45 = vpop.f32.mrb[19].mxu0  ;;  %v2665_v47 = vpop.f32.mrb[17].mxu1 }
 0x756   :  { %v2155_v22 = vadd.f32 %v2644_v35, %v2459_v61  ;;  %v2666_v52 = vadd.f32 %v2665_v47, %v2664_v37  ;;  %v2667_v38 = vpop.f32.mrb[18].mxu1 }
 0x757   :  { %v2668_v24 = vpop.f32.mrb[19].mxu1 }
 0x758   :  { %v2195_v54 = vadd.f32 %v2666_v52, %v2155_v22 }
 0x772   :  { %v2686_v53 = vpop.f32.mrb[20].mxu0 }
 0x773   :  { %v2687_v63 = vpop.f32.mrb[21].mxu0 }
 0x774   :  { %v2688_v10 = vadd.f32 %v2687_v63, %v2686_v53  ;;  %v2689_v12 = vpop.f32.mrb[22].mxu0  ;;  %v2708_v13 = vpop.f32.mrb[20].mxu1 }
 0x775   :  { %v2690_v29 = vpop.f32.mrb[23].mxu0  ;;  %v2709_v58 = vpop.f32.mrb[21].mxu1 }
 0x776   :  { %v2235_v59 = vadd.f32 %v2688_v10, %v2195_v54  ;;  %v2710_v56 = vadd.f32 %v2709_v58, %v2708_v13  ;;  %v2711_v44 = vpop.f32.mrb[22].mxu1 }
 0x777   :  { %v2712_v20 = vpop.f32.mrb[23].mxu1 }
 0x778   :  { %v2275_v6 = vadd.f32 %v2710_v56, %v2235_v59 }
 0x77a   :  { %v2280_v8 = vmax.f32 %v2275_v6, 0.0 }
 0x77c   :  { %v2281_v1 = vpack.c.bf16 %v2280_v8, %v2280_v8 }
 0x77e   :  { %2764 = vmatmul.mubr.msk.bf16.vlgmr.msra.gmra.mrb[24].mxu0 %vm2305_vm2, %v2281_v1 }
 0x851   :  { %v2343_v3 = vpop.f32.mrb[24].mxu0 }
 0x852   :  { %v2344_v4 = vadd.f32 %v2524_v2, %v2343_v3  ;;  %v2765_v7 = vpop.f32.mrb[25].mxu0 }
 0x853   :  { %v2346_v9 = vpop.f32.mrb[26].mxu0 }
 0x854   :  { %v2766_v5 = vpop.f32.mrb[27].mxu0  ;;  %2350 = vst.msk [vmem:[#allocation6] sm:$0x3] %vm2349_vm3, %v2344_v4 }
 0x855   :  { %3066 = shalt.err (!%p3063_p4)
}
 0x856   :  { %s3067_s10 = scalar_lea.hbm %s4016_s11, 32 }
 0x857   :  { %p3068_p5 = scmp.ne.s32.totalorder %s4016_s11, %s3067_s10  ;;  %p3071_p6 = scmp.lt.u32.totalorder %s3067_s10, %s4016_s11 }
 0x859   :  { %p3073_p7 = pnand %p3071_p6, %p3068_p5 }
 0x85b   :  { %3076 = shalt.err (!%p3073_p7)
}
 0x85c   :  { %2360 = dma.vmem_to_hbm [thread:$0]  %s2358_s4, 32, %s4016_s11, [#allocation7]  }
 0x85d   :  { %3077 = dma.done.wait [#allocation7], 32  }
 0x85e   :  { %3078 = vsyncadd [#allocation7], 4294967264 }
 0x85f   :  { %2364 = vsyncpa [#allocation7], 1 }

</bundles_post_ra>
